<compile_context>
chip_gen: v7x
topology: tpu7x:2x2x1
jax: 0.10.0
libtpu: 0.0.40
codegen_flags: <defaults>
</compile_context>

<pallas_src>
import functools

import jax
import jax.numpy as jnp
from jax.experimental import pallas as pl
from jax.experimental.pallas import tpu as pltpu

HIDDEN = 512


def _quantizer_kernel(x_ref, we1_ref, be1_ref, we2_ref, be2_ref,
                      cb_ref, cbt_ref, cbsq_ref,
                      wd1_ref, bd1_ref, wd2_ref, bd2_ref,
                      mse_ref, commit_ref, *, levels, commitment_weight):
    n_rows = x_ref.shape[1]
    n_feat = x_ref.shape[2]
    err_acc = jnp.zeros((n_rows, n_feat), jnp.float32)   # vector accumulator
    commit_last = jnp.float32(0.0)

    # TODO(synk): nn.Dropout is treated as identity (eval mode); training-time
    # stochastic masking is not reproduced.
    for lvl in range(levels):                              # static unroll; levels is tiny
        x = x_ref[lvl]                                     # (B, F) f32, contiguous view

        # --- encoder: Linear(F,512) -> ReLU -> Linear(512,D); bf16 MXU, f32 acc ---
        h1 = jnp.dot(x.astype(jnp.bfloat16), we1_ref[lvl],
                     preferred_element_type=jnp.float32) + be1_ref[lvl]
        h1 = jnp.maximum(h1, 0.0)
        h = jnp.dot(h1.astype(jnp.bfloat16), we2_ref[lvl],
                    preferred_element_type=jnp.float32) + be2_ref[lvl]     # (B, D) f32

        # --- vector quantize: nearest codebook row (squared euclidean distance).
        # cb^T and ||cb||^2 precomputed in the wrapper; ||h||^2 dropped:
        # argmin(||h||^2 - 2 h.c + ||c||^2) == argmax(h.c - 0.5*||c||^2).  f32.
        scores = (jnp.dot(h, cbt_ref[lvl], preferred_element_type=jnp.float32)
                  - 0.5 * cbsq_ref[lvl])                                   # (B, K)
        row_max = jnp.max(scores, axis=-1, keepdims=True)                  # (B, 1)
        k_iota = jax.lax.broadcasted_iota(jnp.int32, scores.shape, 1)
        # tie-safe lowest-index selection, all 2-D (no 1-D argmax intermediate)
        masked_iota = jnp.where(scores >= row_max, k_iota, scores.shape[-1])
        idx = jnp.min(masked_iota, axis=-1, keepdims=True)                 # (B, 1)
        onehot = (k_iota == idx).astype(jnp.float32)                       # (B, K)
        quantized = jnp.dot(onehot, cb_ref[lvl],
                            preferred_element_type=jnp.float32)            # (B, D)

        if lvl == levels - 1:
            # Only the last level's commit loss is returned; earlier ones are dead work.
            commit_last = commitment_weight * jnp.mean((quantized - h) ** 2)

        # --- decoder: Linear(D,512) -> ReLU -> Linear(512,F) ---
        d1 = jnp.dot(quantized.astype(jnp.bfloat16), wd1_ref[lvl],
                     preferred_element_type=jnp.float32) + bd1_ref[lvl]
        d1 = jnp.maximum(d1, 0.0)
        x_hat = jnp.dot(d1.astype(jnp.bfloat16), wd2_ref[lvl],
                        preferred_element_type=jnp.float32) + bd2_ref[lvl]

        err_acc = err_acc + (x_hat - x) ** 2               # per-level VPU add, no reduce

    # sum_l mean_l(err) / levels == sum(err_acc) / (B * F * levels)   (folded /levels)
    mse_ref[0] = jnp.sum(err_acc) * (1.0 / (levels * n_rows * n_feat))
    # PyTorch forward returns the LAST level's commit loss / levels.
    commit_ref[0] = commit_last * (1.0 / levels)


def prepare_params(params):
    """One-time, per-parameter-set preparation (cache the result across calls)."""
    we1, be1, we2, be2, cb, wd1, bd1, wd2, bd2 = params
    f32, bf16 = jnp.float32, jnp.bfloat16
    cb = cb.astype(f32)
    cbt = jnp.transpose(cb, (0, 2, 1))                     # (L, D, K)
    cbsq = jnp.sum(cb * cb, axis=-1)[:, None, :]           # (L, 1, K)
    return (we1.astype(bf16), be1.astype(f32),
            we2.astype(bf16), be2.astype(f32),
            cb, cbt, cbsq,
            wd1.astype(bf16), bd1.astype(f32),
            wd2.astype(bf16), bd2.astype(f32))


@functools.partial(jax.jit, static_argnames=("levels", "commitment_weight"))
def quantizer_forward(x, prepared, *, levels, commitment_weight):
    """x: (B, levels, num_features).  Returns (total_mse/levels, last_commit/levels)."""
    x_t = jnp.transpose(x.astype(jnp.float32), (1, 0, 2))  # (levels, B, F)
    operands = (x_t,) + tuple(prepared)

    kernel = functools.partial(_quantizer_kernel, levels=levels,
                               commitment_weight=commitment_weight)
    # TODO(synk): for production batch sizes, add a batch-tiled grid axis with
    # dimension_semantics=("parallel",) to engage v7x's second TensorCore.
    mse, commit = pl.pallas_call(
        kernel,
        in_specs=[pl.BlockSpec(memory_space=pltpu.MemorySpace.VMEM)
                  for _ in operands],
        out_specs=(pl.BlockSpec(memory_space=pltpu.MemorySpace.SMEM),
                   pl.BlockSpec(memory_space=pltpu.MemorySpace.SMEM)),
        out_shape=(jax.ShapeDtypeStruct((1,), jnp.float32),
                   jax.ShapeDtypeStruct((1,), jnp.float32)),
    )(*operands)
    return mse[0], commit[0]


def _reference_forward(x, params, levels, commitment_weight):
    """Pure-JAX reference.  Uses the same bf16-cast weights (f32 accumulation) as
    the kernel, but the full argmin-of-squared-distance VQ formulation in f32."""
    we1, be1, we2, be2, cb, wd1, bd1, wd2, bd2 = params
    we1b, we2b, wd1b, wd2b = (w.astype(jnp.bfloat16) for w in (we1, we2, wd1, wd2))
    total_mse = jnp.float32(0.0)
    commit = jnp.float32(0.0)
    for i in range(levels):
        xi = x[:, i, :]
        h1 = jnp.maximum(jnp.dot(xi.astype(jnp.bfloat16), we1b[i],
                                 preferred_element_type=jnp.float32) + be1[i], 0.0)
        h = jnp.dot(h1.astype(jnp.bfloat16), we2b[i],
                    preferred_element_type=jnp.float32) + be2[i]
        d = ((h * h).sum(-1, keepdims=True)
             - 2.0 * jnp.dot(h, cb[i].T, preferred_element_type=jnp.float32)
             + (cb[i] * cb[i]).sum(-1)[None, :])
        q = cb[i][jnp.argmin(d, -1)]
        commit = commitment_weight * jnp.mean((q - h) ** 2)
        d1 = jnp.maximum(jnp.dot(q.astype(jnp.bfloat16), wd1b[i],
                                 preferred_element_type=jnp.float32) + bd1[i], 0.0)
        x_hat = jnp.dot(d1.astype(jnp.bfloat16), wd2b[i],
                        preferred_element_type=jnp.float32) + bd2[i]
        total_mse = total_mse + jnp.mean((x_hat - xi) ** 2)
    return total_mse / levels, commit / levels


def make_params(key, levels, num_features, vq_dim, codebook_size):
    ks = jax.random.split(key, 9)
    s = 0.05
    we1 = s * jax.random.normal(ks[0], (levels, num_features, HIDDEN), jnp.float32)
    be1 = s * jax.random.normal(ks[1], (levels, 1, HIDDEN), jnp.float32)
    we2 = s * jax.random.normal(ks[2], (levels, HIDDEN, vq_dim), jnp.float32)
    be2 = s * jax.random.normal(ks[3], (levels, 1, vq_dim), jnp.float32)
    # TODO(synk): kmeans_init + EMA codebook updates of VectorQuantize are not
    # reproduced; codebook is a deterministic random init and treated as frozen.
    cb = jax.random.normal(ks[4], (levels, codebook_size, vq_dim), jnp.float32)
    wd1 = s * jax.random.normal(ks[5], (levels, vq_dim, HIDDEN), jnp.float32)
    bd1 = s * jax.random.normal(ks[6], (levels, 1, HIDDEN), jnp.float32)
    wd2 = s * jax.random.normal(ks[7], (levels, HIDDEN, num_features), jnp.float32)
    bd2 = s * jax.random.normal(ks[8], (levels, 1, num_features), jnp.float32)
    return (we1, be1, we2, be2, cb, wd1, bd1, wd2, bd2)


if __name__ == "__main__":
    config = dict(num_sign_hops=2, num_features=32, vq_dim=16,
                  vq_codebook_size=64, vq_decay=0.99, vq_weight=1.0,
                  mlp_dropout=0.1)
    levels = config["num_sign_hops"] + 1          # 3
    B = 8                                          # rows per level

    key = jax.random.PRNGKey(0)
    kx, kp = jax.random.split(key)
    x = jax.random.normal(kx, (B, levels, config["num_features"]), jnp.float32)
    params = make_params(kp, levels, config["num_features"],
                         config["vq_dim"], config["vq_codebook_size"])

    # One-time, per-parameter-set prep (cached across calls).
    prepared = jax.tree_util.tree_map(jax.block_until_ready, prepare_params(params))

    mse, commit = quantizer_forward(x, prepared, levels=levels,
                                    commitment_weight=config["vq_weight"])
    mse = jax.block_until_ready(mse)
    commit = jax.block_until_ready(commit)

    # Reference uses the same bf16-quantized weights, so tolerances stay tight.
    ref_mse, ref_commit = _reference_forward(x, params, levels, config["vq_weight"])
    assert jnp.allclose(mse, ref_mse, rtol=1e-3, atol=1e-4), (mse, ref_mse)
    assert jnp.allclose(commit, ref_commit, rtol=1e-3, atol=1e-4), (commit, ref_commit)

    print("KERNEL_OK")
</pallas_src>

<mosaic_0001>
module attributes {stable_mosaic.version = 11 : i64} {
  func.func @_quantizer_kernel(%arg0: memref<3x8x32xf32, #tpu.memory_space<vmem>>, %arg1: memref<3x32x512xbf16, #tpu.memory_space<vmem>>, %arg2: memref<3x1x512xf32, #tpu.memory_space<vmem>>, %arg3: memref<3x512x16xbf16, #tpu.memory_space<vmem>>, %arg4: memref<3x1x16xf32, #tpu.memory_space<vmem>>, %arg5: memref<3x64x16xf32, #tpu.memory_space<vmem>>, %arg6: memref<3x16x64xf32, #tpu.memory_space<vmem>>, %arg7: memref<3x1x64xf32, #tpu.memory_space<vmem>>, %arg8: memref<3x16x512xbf16, #tpu.memory_space<vmem>>, %arg9: memref<3x1x512xf32, #tpu.memory_space<vmem>>, %arg10: memref<3x512x32xbf16, #tpu.memory_space<vmem>>, %arg11: memref<3x1x32xf32, #tpu.memory_space<vmem>>, %arg12: memref<1xf32, #tpu.memory_space<smem>>, %arg13: memref<1xf32, #tpu.memory_space<smem>>) attributes {dimension_semantics = [], scalar_prefetch = 0 : i64, scratch_operands = 0 : i64, tpu.core_type = #tpu.core_type<tc>} {
    %cst = arith.constant 0.000000e+00 : f32
    %0 = vector.broadcast %cst : f32 to vector<8x32xf32>
    %c0 = arith.constant 0 : index
    %c0_0 = arith.constant 0 : index
    %c0_1 = arith.constant 0 : index
    %1 = vector.load %arg0[%c0, %c0_0, %c0_1] : memref<3x8x32xf32, #tpu.memory_space<vmem>>, vector<1x8x32xf32>
    %2 = vector.shape_cast %1 : vector<1x8x32xf32> to vector<8x32xf32>
    %3 = arith.truncf %2 : vector<8x32xf32> to vector<8x32xbf16>
    %c0_2 = arith.constant 0 : index
    %c0_3 = arith.constant 0 : index
    %c0_4 = arith.constant 0 : index
    %4 = vector.load %arg1[%c0_2, %c0_3, %c0_4] : memref<3x32x512xbf16, #tpu.memory_space<vmem>>, vector<1x32x512xbf16>
    %5 = vector.shape_cast %4 : vector<1x32x512xbf16> to vector<32x512xbf16>
    %cst_5 = arith.constant dense<0.000000e+00> : vector<8x512xf32>
    %6 = tpu.matmul %3, %5, %cst_5 {dimension_numbers = #tpu.dot_dimension_numbers<[1], [0], [0], [1], [0, 0, 1, 1], [], []>} : vector<8x32xbf16>, vector<32x512xbf16>, vector<8x512xf32> -> vector<8x512xf32>
    %c0_6 = arith.constant 0 : index
    %c0_7 = arith.constant 0 : index
    %c0_8 = arith.constant 0 : index
    %7 = vector.load %arg2[%c0_6, %c0_7, %c0_8] : memref<3x1x512xf32, #tpu.memory_space<vmem>>, vector<1x1x512xf32>
    %8 = vector.shape_cast %7 : vector<1x1x512xf32> to vector<1x512xf32>
    %9 = vector.broadcast %8 : vector<1x512xf32> to vector<8x512xf32>
    %10 = arith.addf %6, %9 : vector<8x512xf32>
    %cst_9 = arith.constant 0.000000e+00 : f32
    %11 = vector.broadcast %cst_9 : f32 to vector<8x512xf32>
    %12 = arith.maximumf %10, %11 : vector<8x512xf32>
    %13 = arith.truncf %12 : vector<8x512xf32> to vector<8x512xbf16>
    %c0_10 = arith.constant 0 : index
    %c0_11 = arith.constant 0 : index
    %c0_12 = arith.constant 0 : index
    %14 = vector.load %arg3[%c0_10, %c0_11, %c0_12] : memref<3x512x16xbf16, #tpu.memory_space<vmem>>, vector<1x512x16xbf16>
    %15 = vector.shape_cast %14 : vector<1x512x16xbf16> to vector<512x16xbf16>
    %cst_13 = arith.constant dense<0.000000e+00> : vector<8x16xf32>
    %16 = tpu.matmul %13, %15, %cst_13 {dimension_numbers = #tpu.dot_dimension_numbers<[1], [0], [0], [1], [0, 0, 1, 1], [], []>} : vector<8x512xbf16>, vector<512x16xbf16>, vector<8x16xf32> -> vector<8x16xf32>
    %c0_14 = arith.constant 0 : index
    %c0_15 = arith.constant 0 : index
    %c0_16 = arith.constant 0 : index
    %17 = vector.load %arg4[%c0_14, %c0_15, %c0_16] : memref<3x1x16xf32, #tpu.memory_space<vmem>>, vector<1x1x16xf32>
    %18 = vector.shape_cast %17 : vector<1x1x16xf32> to vector<1x16xf32>
    %19 = vector.broadcast %18 : vector<1x16xf32> to vector<8x16xf32>
    %20 = arith.addf %16, %19 : vector<8x16xf32>
    %c0_17 = arith.constant 0 : index
    %c0_18 = arith.constant 0 : index
    %c0_19 = arith.constant 0 : index
    %21 = vector.load %arg6[%c0_17, %c0_18, %c0_19] : memref<3x16x64xf32, #tpu.memory_space<vmem>>, vector<1x16x64xf32>
    %22 = vector.shape_cast %21 : vector<1x16x64xf32> to vector<16x64xf32>
    %cst_20 = arith.constant dense<0.000000e+00> : vector<8x64xf32>
    %23 = tpu.matmul %20, %22, %cst_20 {dimension_numbers = #tpu.dot_dimension_numbers<[1], [0], [0], [1], [0, 0, 1, 1], [], []>} : vector<8x16xf32>, vector<16x64xf32>, vector<8x64xf32> -> vector<8x64xf32>
    %c0_21 = arith.constant 0 : index
    %c0_22 = arith.constant 0 : index
    %c0_23 = arith.constant 0 : index
    %24 = vector.load %arg7[%c0_21, %c0_22, %c0_23] : memref<3x1x64xf32, #tpu.memory_space<vmem>>, vector<1x1x64xf32>
    %25 = vector.shape_cast %24 : vector<1x1x64xf32> to vector<1x64xf32>
    %cst_24 = arith.constant 5.000000e-01 : f32
    %26 = vector.broadcast %cst_24 : f32 to vector<1x64xf32>
    %27 = arith.mulf %26, %25 : vector<1x64xf32>
    %28 = vector.broadcast %27 : vector<1x64xf32> to vector<8x64xf32>
    %29 = arith.subf %23, %28 : vector<8x64xf32>
    %cst_25 = arith.constant dense<0xFF800000> : vector<8xf32>
    %30 = vector.multi_reduction <maximumf>, %29, %cst_25 [1] : vector<8x64xf32> to vector<8xf32>
    %31 = vector.shape_cast %30 : vector<8xf32> to vector<8x1xf32>
    %32 = tpu.iota {dimensions = array<i32: 1>} : vector<8x64xi32>
    %33 = vector.broadcast %31 : vector<8x1xf32> to vector<8x64xf32>
    %34 = arith.cmpf oge, %29, %33 : vector<8x64xf32>
    %c64_i32 = arith.constant 64 : i32
    %35 = vector.broadcast %c64_i32 : i32 to vector<8x64xi32>
    %36 = arith.select %34, %32, %35 : vector<8x64xi1>, vector<8x64xi32>
    %cst_26 = arith.constant dense<2147483647> : vector<8xi32>
    %37 = vector.multi_reduction <minsi>, %36, %cst_26 [1] : vector<8x64xi32> to vector<8xi32>
    %38 = vector.shape_cast %37 : vector<8xi32> to vector<8x1xi32>
    %39 = vector.broadcast %38 : vector<8x1xi32> to vector<8x64xi32>
    %40 = arith.cmpi eq, %32, %39 : vector<8x64xi32>
    %41 = arith.extui %40 : vector<8x64xi1> to vector<8x64xi32>
    %42 = arith.sitofp %41 : vector<8x64xi32> to vector<8x64xf32>
    %c0_27 = arith.constant 0 : index
    %c0_28 = arith.constant 0 : index
    %c0_29 = arith.constant 0 : index
    %43 = vector.load %arg5[%c0_27, %c0_28, %c0_29] : memref<3x64x16xf32, #tpu.memory_space<vmem>>, vector<1x64x16xf32>
    %44 = vector.shape_cast %43 : vector<1x64x16xf32> to vector<64x16xf32>
    %cst_30 = arith.constant dense<0.000000e+00> : vector<8x16xf32>
    %45 = tpu.matmul %42, %44, %cst_30 {dimension_numbers = #tpu.dot_dimension_numbers<[1], [0], [0], [1], [0, 0, 1, 1], [], []>} : vector<8x64xf32>, vector<64x16xf32>, vector<8x16xf32> -> vector<8x16xf32>
    %46 = arith.truncf %45 : vector<8x16xf32> to vector<8x16xbf16>
    %c0_31 = arith.constant 0 : index
    %c0_32 = arith.constant 0 : index
    %c0_33 = arith.constant 0 : index
    %47 = vector.load %arg8[%c0_31, %c0_32, %c0_33] : memref<3x16x512xbf16, #tpu.memory_space<vmem>>, vector<1x16x512xbf16>
    %48 = vector.shape_cast %47 : vector<1x16x512xbf16> to vector<16x512xbf16>
    %cst_34 = arith.constant dense<0.000000e+00> : vector<8x512xf32>
    %49 = tpu.matmul %46, %48, %cst_34 {dimension_numbers = #tpu.dot_dimension_numbers<[1], [0], [0], [1], [0, 0, 1, 1], [], []>} : vector<8x16xbf16>, vector<16x512xbf16>, vector<8x512xf32> -> vector<8x512xf32>
    %c0_35 = arith.constant 0 : index
    %c0_36 = arith.constant 0 : index
    %c0_37 = arith.constant 0 : index
    %50 = vector.load %arg9[%c0_35, %c0_36, %c0_37] : memref<3x1x512xf32, #tpu.memory_space<vmem>>, vector<1x1x512xf32>
    %51 = vector.shape_cast %50 : vector<1x1x512xf32> to vector<1x512xf32>
    %52 = vector.broadcast %51 : vector<1x512xf32> to vector<8x512xf32>
    %53 = arith.addf %49, %52 : vector<8x512xf32>
    %cst_38 = arith.constant 0.000000e+00 : f32
    %54 = vector.broadcast %cst_38 : f32 to vector<8x512xf32>
    %55 = arith.maximumf %53, %54 : vector<8x512xf32>
    %56 = arith.truncf %55 : vector<8x512xf32> to vector<8x512xbf16>
    %c0_39 = arith.constant 0 : index
    %c0_40 = arith.constant 0 : index
    %c0_41 = arith.constant 0 : index
    %57 = vector.load %arg10[%c0_39, %c0_40, %c0_41] : memref<3x512x32xbf16, #tpu.memory_space<vmem>>, vector<1x512x32xbf16>
    %58 = vector.shape_cast %57 : vector<1x512x32xbf16> to vector<512x32xbf16>
    %cst_42 = arith.constant dense<0.000000e+00> : vector<8x32xf32>
    %59 = tpu.matmul %56, %58, %cst_42 {dimension_numbers = #tpu.dot_dimension_numbers<[1], [0], [0], [1], [0, 0, 1, 1], [], []>} : vector<8x512xbf16>, vector<512x32xbf16>, vector<8x32xf32> -> vector<8x32xf32>
    %c0_43 = arith.constant 0 : index
    %c0_44 = arith.constant 0 : index
    %c0_45 = arith.constant 0 : index
    %60 = vector.load %arg11[%c0_43, %c0_44, %c0_45] : memref<3x1x32xf32, #tpu.memory_space<vmem>>, vector<1x1x32xf32>
    %61 = vector.shape_cast %60 : vector<1x1x32xf32> to vector<1x32xf32>
    %62 = vector.broadcast %61 : vector<1x32xf32> to vector<8x32xf32>
    %63 = arith.addf %59, %62 : vector<8x32xf32>
    %64 = arith.subf %63, %2 : vector<8x32xf32>
    %65 = arith.mulf %64, %64 : vector<8x32xf32>
    %66 = arith.addf %0, %65 : vector<8x32xf32>
    %c1 = arith.constant 1 : index
    %c0_46 = arith.constant 0 : index
    %c0_47 = arith.constant 0 : index
    %67 = vector.load %arg0[%c1, %c0_46, %c0_47] : memref<3x8x32xf32, #tpu.memory_space<vmem>>, vector<1x8x32xf32>
    %68 = vector.shape_cast %67 : vector<1x8x32xf32> to vector<8x32xf32>
    %69 = arith.truncf %68 : vector<8x32xf32> to vector<8x32xbf16>
    %c1_48 = arith.constant 1 : index
    %c0_49 = arith.constant 0 : index
    %c0_50 = arith.constant 0 : index
    %70 = vector.load %arg1[%c1_48, %c0_49, %c0_50] : memref<3x32x512xbf16, #tpu.memory_space<vmem>>, vector<1x32x512xbf16>
    %71 = vector.shape_cast %70 : vector<1x32x512xbf16> to vector<32x512xbf16>
    %cst_51 = arith.constant dense<0.000000e+00> : vector<8x512xf32>
    %72 = tpu.matmul %69, %71, %cst_51 {dimension_numbers = #tpu.dot_dimension_numbers<[1], [0], [0], [1], [0, 0, 1, 1], [], []>} : vector<8x32xbf16>, vector<32x512xbf16>, vector<8x512xf32> -> vector<8x512xf32>
    %c1_52 = arith.constant 1 : index
    %c0_53 = arith.constant 0 : index
    %c0_54 = arith.constant 0 : index
    %73 = vector.load %arg2[%c1_52, %c0_53, %c0_54] : memref<3x1x512xf32, #tpu.memory_space<vmem>>, vector<1x1x512xf32>
    %74 = vector.shape_cast %73 : vector<1x1x512xf32> to vector<1x512xf32>
    %75 = vector.broadcast %74 : vector<1x512xf32> to vector<8x512xf32>
    %76 = arith.addf %72, %75 : vector<8x512xf32>
    %cst_55 = arith.constant 0.000000e+00 : f32
    %77 = vector.broadcast %cst_55 : f32 to vector<8x512xf32>
    %78 = arith.maximumf %76, %77 : vector<8x512xf32>
    %79 = arith.truncf %78 : vector<8x512xf32> to vector<8x512xbf16>
    %c1_56 = arith.constant 1 : index
    %c0_57 = arith.constant 0 : index
    %c0_58 = arith.constant 0 : index
    %80 = vector.load %arg3[%c1_56, %c0_57, %c0_58] : memref<3x512x16xbf16, #tpu.memory_space<vmem>>, vector<1x512x16xbf16>
    %81 = vector.shape_cast %80 : vector<1x512x16xbf16> to vector<512x16xbf16>
    %cst_59 = arith.constant dense<0.000000e+00> : vector<8x16xf32>
    %82 = tpu.matmul %79, %81, %cst_59 {dimension_numbers = #tpu.dot_dimension_numbers<[1], [0], [0], [1], [0, 0, 1, 1], [], []>} : vector<8x512xbf16>, vector<512x16xbf16>, vector<8x16xf32> -> vector<8x16xf32>
    %c1_60 = arith.constant 1 : index
    %c0_61 = arith.constant 0 : index
    %c0_62 = arith.constant 0 : index
    %83 = vector.load %arg4[%c1_60, %c0_61, %c0_62] : memref<3x1x16xf32, #tpu.memory_space<vmem>>, vector<1x1x16xf32>
    %84 = vector.shape_cast %83 : vector<1x1x16xf32> to vector<1x16xf32>
    %85 = vector.broadcast %84 : vector<1x16xf32> to vector<8x16xf32>
    %86 = arith.addf %82, %85 : vector<8x16xf32>
    %c1_63 = arith.constant 1 : index
    %c0_64 = arith.constant 0 : index
    %c0_65 = arith.constant 0 : index
    %87 = vector.load %arg6[%c1_63, %c0_64, %c0_65] : memref<3x16x64xf32, #tpu.memory_space<vmem>>, vector<1x16x64xf32>
    %88 = vector.shape_cast %87 : vector<1x16x64xf32> to vector<16x64xf32>
    %cst_66 = arith.constant dense<0.000000e+00> : vector<8x64xf32>
    %89 = tpu.matmul %86, %88, %cst_66 {dimension_numbers = #tpu.dot_dimension_numbers<[1], [0], [0], [1], [0, 0, 1, 1], [], []>} : vector<8x16xf32>, vector<16x64xf32>, vector<8x64xf32> -> vector<8x64xf32>
    %c1_67 = arith.constant 1 : index
    %c0_68 = arith.constant 0 : index
    %c0_69 = arith.constant 0 : index
    %90 = vector.load %arg7[%c1_67, %c0_68, %c0_69] : memref<3x1x64xf32, #tpu.memory_space<vmem>>, vector<1x1x64xf32>
    %91 = vector.shape_cast %90 : vector<1x1x64xf32> to vector<1x64xf32>
    %cst_70 = arith.constant 5.000000e-01 : f32
    %92 = vector.broadcast %cst_70 : f32 to vector<1x64xf32>
    %93 = arith.mulf %92, %91 : vector<1x64xf32>
    %94 = vector.broadcast %93 : vector<1x64xf32> to vector<8x64xf32>
    %95 = arith.subf %89, %94 : vector<8x64xf32>
    %cst_71 = arith.constant dense<0xFF800000> : vector<8xf32>
    %96 = vector.multi_reduction <maximumf>, %95, %cst_71 [1] : vector<8x64xf32> to vector<8xf32>
    %97 = vector.shape_cast %96 : vector<8xf32> to vector<8x1xf32>
    %98 = tpu.iota {dimensions = array<i32: 1>} : vector<8x64xi32>
    %99 = vector.broadcast %97 : vector<8x1xf32> to vector<8x64xf32>
    %100 = arith.cmpf oge, %95, %99 : vector<8x64xf32>
    %c64_i32_72 = arith.constant 64 : i32
    %101 = vector.broadcast %c64_i32_72 : i32 to vector<8x64xi32>
    %102 = arith.select %100, %98, %101 : vector<8x64xi1>, vector<8x64xi32>
    %cst_73 = arith.constant dense<2147483647> : vector<8xi32>
    %103 = vector.multi_reduction <minsi>, %102, %cst_73 [1] : vector<8x64xi32> to vector<8xi32>
    %104 = vector.shape_cast %103 : vector<8xi32> to vector<8x1xi32>
    %105 = vector.broadcast %104 : vector<8x1xi32> to vector<8x64xi32>
    %106 = arith.cmpi eq, %98, %105 : vector<8x64xi32>
    %107 = arith.extui %106 : vector<8x64xi1> to vector<8x64xi32>
    %108 = arith.sitofp %107 : vector<8x64xi32> to vector<8x64xf32>
    %c1_74 = arith.constant 1 : index
    %c0_75 = arith.constant 0 : index
    %c0_76 = arith.constant 0 : index
    %109 = vector.load %arg5[%c1_74, %c0_75, %c0_76] : memref<3x64x16xf32, #tpu.memory_space<vmem>>, vector<1x64x16xf32>
    %110 = vector.shape_cast %109 : vector<1x64x16xf32> to vector<64x16xf32>
    %cst_77 = arith.constant dense<0.000000e+00> : vector<8x16xf32>
    %111 = tpu.matmul %108, %110, %cst_77 {dimension_numbers = #tpu.dot_dimension_numbers<[1], [0], [0], [1], [0, 0, 1, 1], [], []>} : vector<8x64xf32>, vector<64x16xf32>, vector<8x16xf32> -> vector<8x16xf32>
    %112 = arith.truncf %111 : vector<8x16xf32> to vector<8x16xbf16>
    %c1_78 = arith.constant 1 : index
    %c0_79 = arith.constant 0 : index
    %c0_80 = arith.constant 0 : index
    %113 = vector.load %arg8[%c1_78, %c0_79, %c0_80] : memref<3x16x512xbf16, #tpu.memory_space<vmem>>, vector<1x16x512xbf16>
    %114 = vector.shape_cast %113 : vector<1x16x512xbf16> to vector<16x512xbf16>
    %cst_81 = arith.constant dense<0.000000e+00> : vector<8x512xf32>
    %115 = tpu.matmul %112, %114, %cst_81 {dimension_numbers = #tpu.dot_dimension_numbers<[1], [0], [0], [1], [0, 0, 1, 1], [], []>} : vector<8x16xbf16>, vector<16x512xbf16>, vector<8x512xf32> -> vector<8x512xf32>
    %c1_82 = arith.constant 1 : index
    %c0_83 = arith.constant 0 : index
    %c0_84 = arith.constant 0 : index
    %116 = vector.load %arg9[%c1_82, %c0_83, %c0_84] : memref<3x1x512xf32, #tpu.memory_space<vmem>>, vector<1x1x512xf32>
    %117 = vector.shape_cast %116 : vector<1x1x512xf32> to vector<1x512xf32>
    %118 = vector.broadcast %117 : vector<1x512xf32> to vector<8x512xf32>
    %119 = arith.addf %115, %118 : vector<8x512xf32>
    %cst_85 = arith.constant 0.000000e+00 : f32
    %120 = vector.broadcast %cst_85 : f32 to vector<8x512xf32>
    %121 = arith.maximumf %119, %120 : vector<8x512xf32>
    %122 = arith.truncf %121 : vector<8x512xf32> to vector<8x512xbf16>
    %c1_86 = arith.constant 1 : index
    %c0_87 = arith.constant 0 : index
    %c0_88 = arith.constant 0 : index
    %123 = vector.load %arg10[%c1_86, %c0_87, %c0_88] : memref<3x512x32xbf16, #tpu.memory_space<vmem>>, vector<1x512x32xbf16>
    %124 = vector.shape_cast %123 : vector<1x512x32xbf16> to vector<512x32xbf16>
    %cst_89 = arith.constant dense<0.000000e+00> : vector<8x32xf32>
    %125 = tpu.matmul %122, %124, %cst_89 {dimension_numbers = #tpu.dot_dimension_numbers<[1], [0], [0], [1], [0, 0, 1, 1], [], []>} : vector<8x512xbf16>, vector<512x32xbf16>, vector<8x32xf32> -> vector<8x32xf32>
    %c1_90 = arith.constant 1 : index
    %c0_91 = arith.constant 0 : index
    %c0_92 = arith.constant 0 : index
    %126 = vector.load %arg11[%c1_90, %c0_91, %c0_92] : memref<3x1x32xf32, #tpu.memory_space<vmem>>, vector<1x1x32xf32>
    %127 = vector.shape_cast %126 : vector<1x1x32xf32> to vector<1x32xf32>
    %128 = vector.broadcast %127 : vector<1x32xf32> to vector<8x32xf32>
    %129 = arith.addf %125, %128 : vector<8x32xf32>
    %130 = arith.subf %129, %68 : vector<8x32xf32>
    %131 = arith.mulf %130, %130 : vector<8x32xf32>
    %132 = arith.addf %66, %131 : vector<8x32xf32>
    %c2 = arith.constant 2 : index
    %c0_93 = arith.constant 0 : index
    %c0_94 = arith.constant 0 : index
    %133 = vector.load %arg0[%c2, %c0_93, %c0_94] : memref<3x8x32xf32, #tpu.memory_space<vmem>>, vector<1x8x32xf32>
    %134 = vector.shape_cast %133 : vector<1x8x32xf32> to vector<8x32xf32>
    %135 = arith.truncf %134 : vector<8x32xf32> to vector<8x32xbf16>
    %c2_95 = arith.constant 2 : index
    %c0_96 = arith.constant 0 : index
    %c0_97 = arith.constant 0 : index
    %136 = vector.load %arg1[%c2_95, %c0_96, %c0_97] : memref<3x32x512xbf16, #tpu.memory_space<vmem>>, vector<1x32x512xbf16>
    %137 = vector.shape_cast %136 : vector<1x32x512xbf16> to vector<32x512xbf16>
    %cst_98 = arith.constant dense<0.000000e+00> : vector<8x512xf32>
    %138 = tpu.matmul %135, %137, %cst_98 {dimension_numbers = #tpu.dot_dimension_numbers<[1], [0], [0], [1], [0, 0, 1, 1], [], []>} : vector<8x32xbf16>, vector<32x512xbf16>, vector<8x512xf32> -> vector<8x512xf32>
    %c2_99 = arith.constant 2 : index
    %c0_100 = arith.constant 0 : index
    %c0_101 = arith.constant 0 : index
    %139 = vector.load %arg2[%c2_99, %c0_100, %c0_101] : memref<3x1x512xf32, #tpu.memory_space<vmem>>, vector<1x1x512xf32>
    %140 = vector.shape_cast %139 : vector<1x1x512xf32> to vector<1x512xf32>
    %141 = vector.broadcast %140 : vector<1x512xf32> to vector<8x512xf32>
    %142 = arith.addf %138, %141 : vector<8x512xf32>
    %cst_102 = arith.constant 0.000000e+00 : f32
    %143 = vector.broadcast %cst_102 : f32 to vector<8x512xf32>
    %144 = arith.maximumf %142, %143 : vector<8x512xf32>
    %145 = arith.truncf %144 : vector<8x512xf32> to vector<8x512xbf16>
    %c2_103 = arith.constant 2 : index
    %c0_104 = arith.constant 0 : index
    %c0_105 = arith.constant 0 : index
    %146 = vector.load %arg3[%c2_103, %c0_104, %c0_105] : memref<3x512x16xbf16, #tpu.memory_space<vmem>>, vector<1x512x16xbf16>
    %147 = vector.shape_cast %146 : vector<1x512x16xbf16> to vector<512x16xbf16>
    %cst_106 = arith.constant dense<0.000000e+00> : vector<8x16xf32>
    %148 = tpu.matmul %145, %147, %cst_106 {dimension_numbers = #tpu.dot_dimension_numbers<[1], [0], [0], [1], [0, 0, 1, 1], [], []>} : vector<8x512xbf16>, vector<512x16xbf16>, vector<8x16xf32> -> vector<8x16xf32>
    %c2_107 = arith.constant 2 : index
    %c0_108 = arith.constant 0 : index
    %c0_109 = arith.constant 0 : index
    %149 = vector.load %arg4[%c2_107, %c0_108, %c0_109] : memref<3x1x16xf32, #tpu.memory_space<vmem>>, vector<1x1x16xf32>
    %150 = vector.shape_cast %149 : vector<1x1x16xf32> to vector<1x16xf32>
    %151 = vector.broadcast %150 : vector<1x16xf32> to vector<8x16xf32>
    %152 = arith.addf %148, %151 : vector<8x16xf32>
    %c2_110 = arith.constant 2 : index
    %c0_111 = arith.constant 0 : index
    %c0_112 = arith.constant 0 : index
    %153 = vector.load %arg6[%c2_110, %c0_111, %c0_112] : memref<3x16x64xf32, #tpu.memory_space<vmem>>, vector<1x16x64xf32>
    %154 = vector.shape_cast %153 : vector<1x16x64xf32> to vector<16x64xf32>
    %cst_113 = arith.constant dense<0.000000e+00> : vector<8x64xf32>
    %155 = tpu.matmul %152, %154, %cst_113 {dimension_numbers = #tpu.dot_dimension_numbers<[1], [0], [0], [1], [0, 0, 1, 1], [], []>} : vector<8x16xf32>, vector<16x64xf32>, vector<8x64xf32> -> vector<8x64xf32>
    %c2_114 = arith.constant 2 : index
    %c0_115 = arith.constant 0 : index
    %c0_116 = arith.constant 0 : index
    %156 = vector.load %arg7[%c2_114, %c0_115, %c0_116] : memref<3x1x64xf32, #tpu.memory_space<vmem>>, vector<1x1x64xf32>
    %157 = vector.shape_cast %156 : vector<1x1x64xf32> to vector<1x64xf32>
    %cst_117 = arith.constant 5.000000e-01 : f32
    %158 = vector.broadcast %cst_117 : f32 to vector<1x64xf32>
    %159 = arith.mulf %158, %157 : vector<1x64xf32>
    %160 = vector.broadcast %159 : vector<1x64xf32> to vector<8x64xf32>
    %161 = arith.subf %155, %160 : vector<8x64xf32>
    %cst_118 = arith.constant dense<0xFF800000> : vector<8xf32>
    %162 = vector.multi_reduction <maximumf>, %161, %cst_118 [1] : vector<8x64xf32> to vector<8xf32>
    %163 = vector.shape_cast %162 : vector<8xf32> to vector<8x1xf32>
    %164 = tpu.iota {dimensions = array<i32: 1>} : vector<8x64xi32>
    %165 = vector.broadcast %163 : vector<8x1xf32> to vector<8x64xf32>
    %166 = arith.cmpf oge, %161, %165 : vector<8x64xf32>
    %c64_i32_119 = arith.constant 64 : i32
    %167 = vector.broadcast %c64_i32_119 : i32 to vector<8x64xi32>
    %168 = arith.select %166, %164, %167 : vector<8x64xi1>, vector<8x64xi32>
    %cst_120 = arith.constant dense<2147483647> : vector<8xi32>
    %169 = vector.multi_reduction <minsi>, %168, %cst_120 [1] : vector<8x64xi32> to vector<8xi32>
    %170 = vector.shape_cast %169 : vector<8xi32> to vector<8x1xi32>
    %171 = vector.broadcast %170 : vector<8x1xi32> to vector<8x64xi32>
    %172 = arith.cmpi eq, %164, %171 : vector<8x64xi32>
    %173 = arith.extui %172 : vector<8x64xi1> to vector<8x64xi32>
    %174 = arith.sitofp %173 : vector<8x64xi32> to vector<8x64xf32>
    %c2_121 = arith.constant 2 : index
    %c0_122 = arith.constant 0 : index
    %c0_123 = arith.constant 0 : index
    %175 = vector.load %arg5[%c2_121, %c0_122, %c0_123] : memref<3x64x16xf32, #tpu.memory_space<vmem>>, vector<1x64x16xf32>
    %176 = vector.shape_cast %175 : vector<1x64x16xf32> to vector<64x16xf32>
    %cst_124 = arith.constant dense<0.000000e+00> : vector<8x16xf32>
    %177 = tpu.matmul %174, %176, %cst_124 {dimension_numbers = #tpu.dot_dimension_numbers<[1], [0], [0], [1], [0, 0, 1, 1], [], []>} : vector<8x64xf32>, vector<64x16xf32>, vector<8x16xf32> -> vector<8x16xf32>
    %178 = arith.subf %177, %152 : vector<8x16xf32>
    %179 = arith.mulf %178, %178 : vector<8x16xf32>
    %180 = vector.shape_cast %179 : vector<8x16xf32> to vector<1x8x16xf32>
    %cst_125 = arith.constant dense<0.000000e+00> : vector<1xf32>
    %181 = vector.multi_reduction <add>, %180, %cst_125 [1, 2] : vector<1x8x16xf32> to vector<1xf32>
    %182 = vector.shape_cast %181 : vector<1xf32> to vector<1x1x1xf32>
    %183 = vector.extract %182[0, 0, 0] : f32 from vector<1x1x1xf32>
    %cst_126 = arith.constant 1.280000e+02 : f32
    %184 = arith.divf %183, %cst_126 : f32
    %cst_127 = arith.constant 1.000000e+00 : f32
    %185 = arith.mulf %cst_127, %184 : f32
    %186 = arith.truncf %177 : vector<8x16xf32> to vector<8x16xbf16>
    %c2_128 = arith.constant 2 : index
    %c0_129 = arith.constant 0 : index
    %c0_130 = arith.constant 0 : index
    %187 = vector.load %arg8[%c2_128, %c0_129, %c0_130] : memref<3x16x512xbf16, #tpu.memory_space<vmem>>, vector<1x16x512xbf16>
    %188 = vector.shape_cast %187 : vector<1x16x512xbf16> to vector<16x512xbf16>
    %cst_131 = arith.constant dense<0.000000e+00> : vector<8x512xf32>
    %189 = tpu.matmul %186, %188, %cst_131 {dimension_numbers = #tpu.dot_dimension_numbers<[1], [0], [0], [1], [0, 0, 1, 1], [], []>} : vector<8x16xbf16>, vector<16x512xbf16>, vector<8x512xf32> -> vector<8x512xf32>
    %c2_132 = arith.constant 2 : index
    %c0_133 = arith.constant 0 : index
    %c0_134 = arith.constant 0 : index
    %190 = vector.load %arg9[%c2_132, %c0_133, %c0_134] : memref<3x1x512xf32, #tpu.memory_space<vmem>>, vector<1x1x512xf32>
    %191 = vector.shape_cast %190 : vector<1x1x512xf32> to vector<1x512xf32>
    %192 = vector.broadcast %191 : vector<1x512xf32> to vector<8x512xf32>
    %193 = arith.addf %189, %192 : vector<8x512xf32>
    %cst_135 = arith.constant 0.000000e+00 : f32
    %194 = vector.broadcast %cst_135 : f32 to vector<8x512xf32>
    %195 = arith.maximumf %193, %194 : vector<8x512xf32>
    %196 = arith.truncf %195 : vector<8x512xf32> to vector<8x512xbf16>
    %c2_136 = arith.constant 2 : index
    %c0_137 = arith.constant 0 : index
    %c0_138 = arith.constant 0 : index
    %197 = vector.load %arg10[%c2_136, %c0_137, %c0_138] : memref<3x512x32xbf16, #tpu.memory_space<vmem>>, vector<1x512x32xbf16>
    %198 = vector.shape_cast %197 : vector<1x512x32xbf16> to vector<512x32xbf16>
    %cst_139 = arith.constant dense<0.000000e+00> : vector<8x32xf32>
    %199 = tpu.matmul %196, %198, %cst_139 {dimension_numbers = #tpu.dot_dimension_numbers<[1], [0], [0], [1], [0, 0, 1, 1], [], []>} : vector<8x512xbf16>, vector<512x32xbf16>, vector<8x32xf32> -> vector<8x32xf32>
    %c2_140 = arith.constant 2 : index
    %c0_141 = arith.constant 0 : index
    %c0_142 = arith.constant 0 : index
    %200 = vector.load %arg11[%c2_140, %c0_141, %c0_142] : memref<3x1x32xf32, #tpu.memory_space<vmem>>, vector<1x1x32xf32>
    %201 = vector.shape_cast %200 : vector<1x1x32xf32> to vector<1x32xf32>
    %202 = vector.broadcast %201 : vector<1x32xf32> to vector<8x32xf32>
    %203 = arith.addf %199, %202 : vector<8x32xf32>
    %204 = arith.subf %203, %134 : vector<8x32xf32>
    %205 = arith.mulf %204, %204 : vector<8x32xf32>
    %206 = arith.addf %132, %205 : vector<8x32xf32>
    %207 = vector.shape_cast %206 : vector<8x32xf32> to vector<1x8x32xf32>
    %cst_143 = arith.constant dense<0.000000e+00> : vector<1xf32>
    %208 = vector.multi_reduction <add>, %207, %cst_143 [1, 2] : vector<1x8x32xf32> to vector<1xf32>
    %209 = vector.shape_cast %208 : vector<1xf32> to vector<1x1x1xf32>
    %210 = vector.extract %209[0, 0, 0] : f32 from vector<1x1x1xf32>
    %cst_144 = arith.constant 0.00130208337 : f32
    %211 = arith.mulf %210, %cst_144 : f32
    %c0_145 = arith.constant 0 : index
    %212 = memref.load %arg12[%c0_145] : memref<1xf32, #tpu.memory_space<smem>>
    memref.store %211, %arg12[%c0_145] : memref<1xf32, #tpu.memory_space<smem>>
    %cst_146 = arith.constant 0.333333343 : f32
    %213 = arith.mulf %185, %cst_146 : f32
    %c0_147 = arith.constant 0 : index
    %214 = memref.load %arg13[%c0_147] : memref<1xf32, #tpu.memory_space<smem>>
    memref.store %213, %arg13[%c0_147] : memref<1xf32, #tpu.memory_space<smem>>
    return
  }
}

</mosaic_0001>

<bundles_post_ra>
// kernel: quantizer_forward.1
= control target key start
LH: loop header
LB: loop body
LE: loop exit
PB: predicated region body
PF: predicated region fallthrough
CT: control target
= control target key end

     0   :  { %19 = vsyncpa [#allocation3], 0  ;;  %v4948_v2 = vmov 0   ;;  %vm118_vm0 = vcmask 261120   ;;  %v4949_v43 = vmov 0.0|0.0   ;;  %s6008_s0 = inlined_call_operand.vmem [shape: f32[3,8,32], index: 0, kind: input, shape index: {}]   ;;  %s6009_s1 = inlined_call_operand.vmem [shape: bf16[3,32,512], index: 1, kind: input, shape index: {}]   ;;  %s6010_s2 = inlined_call_operand.vmem [shape: f32[3,1,512], index: 2, kind: input, shape index: {}]   ;;  %s6011_s3 = inlined_call_operand.vmem [shape: bf16[3,512,16], index: 3, kind: input, shape index: {}]   ;;  %s6012_s4 = inlined_call_operand.vmem [shape: f32[3,1,16], index: 4, kind: input, shape index: {}]   ;;  %s6013_s5 = inlined_call_operand.vmem [shape: f32[3,64,16], index: 5, kind: input, shape index: {}]   ;;  %s6014_s6 = inlined_call_operand.vmem [shape: f32[3,16,64], index: 6, kind: input, shape index: {}]   ;;  %s6015_s7 = inlined_call_operand.vmem [shape: f32[3,1,64], index: 7, kind: input, shape index: {}]   ;;  %s6016_s8 = inlined_call_operand.vmem [shape: bf16[3,16,512], index: 8, kind: input, shape index: {}]   ;;  %s6017_s9 = inlined_call_operand.vmem [shape: f32[3,1,512], index: 9, kind: input, shape index: {}]   ;;  %s6018_s10 = inlined_call_operand.vmem [shape: bf16[3,512,32], index: 10, kind: input, shape index: {}]   ;;  %s6019_s11 = inlined_call_operand.vmem [shape: f32[3,1,32], index: 11, kind: input, shape index: {}]   ;;  %s6020_s12 = inlined_call_operand.hbm [shape: f32[1], index: 12, kind: output, shape index: {0}]   ;;  %s6021_s13 = inlined_call_operand.hbm [shape: f32[1], index: 13, kind: output, shape index: {1}]  }
   0x1   :  { %v4677_v0 = vld [vmem:[%s6009_s1 + $0x4] ss:$16 sps:$4 sm:$0xff]   ;;  %v4679_v1 = vld [vmem:[%s6009_s1 + $0xc] ss:$16 sps:$4 sm:$0xff]   ;;  %154 = vmatprep.mubr.bf16.mxu0 %v4948_v2  ;;  %195 = vmatprep.mubr.bf16.mxu1 %v4948_v2  ;;  %v4681_v3 = vld [vmem:[%s6009_s1] ss:$16 sps:$4 sm:$0xff]  }
   0x2   :  { %122 = vmatprep.subr.bf16.mxu0 %v4677_v0  ;;  %v4682_v4 = vld [vmem:[%s6009_s1 + $0x8] ss:$16 sps:$4 sm:$0xff]   ;;  %163 = vmatprep.subr.bf16.mxu1 %v4679_v1  ;;  %v4683_v5 = vld [vmem:[%s6009_s1 + $0x24] ss:$16 sps:$4 sm:$0xff]   ;;  %v4685_v6 = vld [vmem:[%s6009_s1 + $0x2c] ss:$16 sps:$4 sm:$0xff]  }
   0x3   :  { %123 = vmatpush1.bf16.msra.mxu0 %v4681_v3  ;;  %164 = vmatpush1.bf16.msra.mxu1 %v4682_v4  ;;  %v4687_v7 = vld [vmem:[%s6009_s1 + $0x20] ss:$16 sps:$4 sm:$0xff]   ;;  %v4688_v8 = vld [vmem:[%s6009_s1 + $0x28] ss:$16 sps:$4 sm:$0xff]  }
   0x4   :  { %124 = vmatprep.subr.bf16.mxu0 %v4683_v5  ;;  %v46_v9 = vld [vmem:[%s6008_s0] sm:$0xff]  ;;  %165 = vmatprep.subr.bf16.mxu1 %v4685_v6  ;;  %v4693_v15 = vld [vmem:[%s6011_s3 + $0x48] sm:$0xff]   ;;  %v4697_v19 = vld [vmem:[%s6011_s3 + $0x50] sm:$0xff]  }
   0x5   :  { %v4689_v10 = vld [vmem:[%s6011_s3 + $0x40] sm:$0xff]   ;;  %v47_v11 = vpack.c.bf16 %v46_v9, %v46_v9  ;;  %v4694_v16 = vld [vmem:[%s6011_s3 + $0xc8] sm:$0xff]   ;;  %v4698_v20 = vld [vmem:[%s6011_s3 + $0xd0] sm:$0xff]  }
   0x6   :  { %v4690_v12 = vld [vmem:[%s6011_s3 + $0xc0] sm:$0xff]   ;;  %v4695_v17 = vld [vmem:[%s6011_s3 + $0x8] sm:$0xff]   ;;  %v4699_v21 = vld [vmem:[%s6011_s3 + $0x10] sm:$0xff]  }
   0x7   :  { %125 = vmatpush1.bf16.msra.mxu0 %v4687_v7  ;;  %166 = vmatpush1.bf16.msra.mxu1 %v4688_v8  ;;  %v4691_v13 = vld [vmem:[%s6011_s3] sm:$0xff]   ;;  %v4696_v18 = vld [vmem:[%s6011_s3 + $0x88] sm:$0xff]   ;;  %v4700_v22 = vld [vmem:[%s6011_s3 + $0x90] sm:$0xff]  }
   0x8   :  { %4244 = vmatprep.subr.bf16.mxu0 %v4689_v10  ;;  %4266 = vmatprep.subr.bf16.mxu1 %v4690_v12  ;;  %v4692_v14 = vld [vmem:[%s6011_s3 + $0x80] sm:$0xff]   ;;  %v4701_v23 = vld [vmem:[%s6011_s3 + $0x58] sm:$0xff]   ;;  %v4709_v31 = vld [vmem:[%s6011_s3 + $0x68] sm:$0xff]  }
   0x9   :  { %v4702_v24 = vld [vmem:[%s6011_s3 + $0xd8] sm:$0xff]   ;;  %v4705_v27 = vld [vmem:[%s6011_s3 + $0x60] sm:$0xff]   ;;  %v4710_v32 = vld [vmem:[%s6011_s3 + $0xe8] sm:$0xff]  }
   0xa   :  { %3685 = vmatmul.mubr.msk.bf16.vlgmr.msra.gmra.mrb[0].mxu0 %vm118_vm0, %v47_v11  ;;  %3686 = vmatmul.mubr.msk.bf16.vlgmr.msra.gmra.mrb[0].mxu1 %vm118_vm0, %v47_v11  ;;  %v4703_v25 = vld [vmem:[%s6011_s3 + $0x18] sm:$0xff]   ;;  %v4706_v28 = vld [vmem:[%s6011_s3 + $0xe0] sm:$0xff]   ;;  %v4711_v33 = vld [vmem:[%s6011_s3 + $0x28] sm:$0xff]  }
   0xb   :  { %4245 = vmatpush3.bf16.msra.mxu0 %v4691_v13  ;;  %4267 = vmatpush3.bf16.msra.mxu1 %v4692_v14  ;;  %v4704_v26 = vld [vmem:[%s6011_s3 + $0x98] sm:$0xff]   ;;  %v4707_v29 = vld [vmem:[%s6011_s3 + $0x20] sm:$0xff]   ;;  %v4712_v34 = vld [vmem:[%s6011_s3 + $0xa8] sm:$0xff]  }
   0xc   :  { %4246 = vmatprep.subr.bf16.mxu0 %v4693_v15  ;;  %4268 = vmatprep.subr.bf16.mxu1 %v4694_v16  ;;  %v4708_v30 = vld [vmem:[%s6011_s3 + $0xa0] sm:$0xff]   ;;  %v4713_v35 = vld [vmem:[%s6011_s3 + $0x70] sm:$0xff]   ;;  %v4717_v39 = vld [vmem:[%s6011_s3 + $0x78] sm:$0xff]  }
   0xd   :  { %v4714_v36 = vld [vmem:[%s6011_s3 + $0xf0] sm:$0xff]   ;;  %v4718_v40 = vld [vmem:[%s6011_s3 + $0xf8] sm:$0xff]  }
   0xe   :  { %v4715_v37 = vld [vmem:[%s6011_s3 + $0x30] sm:$0xff]   ;;  %v4719_v41 = vld [vmem:[%s6011_s3 + $0x38] sm:$0xff]  }
   0xf   :  { %4247 = vmatpush3.bf16.msra.mxu0 %v4695_v17  ;;  %4269 = vmatpush3.bf16.msra.mxu1 %v4696_v18  ;;  %v4716_v38 = vld [vmem:[%s6011_s3 + $0xb0] sm:$0xff]   ;;  %v4720_v42 = vld [vmem:[%s6011_s3 + $0xb8] sm:$0xff]  }
  0x10   :  { %4248 = vmatprep.subr.bf16.mxu0 %v4697_v19  ;;  %4270 = vmatprep.subr.bf16.mxu1 %v4698_v20 }
  0x13   :  { %4249 = vmatpush3.bf16.msra.mxu0 %v4699_v21  ;;  %4271 = vmatpush3.bf16.msra.mxu1 %v4700_v22 }
  0x14   :  { %4250 = vmatprep.subr.bf16.mxu0 %v4701_v23  ;;  %4272 = vmatprep.subr.bf16.mxu1 %v4702_v24 }
  0x17   :  { %4251 = vmatpush3.bf16.msra.mxu0 %v4703_v25  ;;  %4273 = vmatpush3.bf16.msra.mxu1 %v4704_v26 }
  0x18   :  { %4252 = vmatprep.subr.bf16.mxu0 %v4705_v27  ;;  %4274 = vmatprep.subr.bf16.mxu1 %v4706_v28 }
  0x1b   :  { %4253 = vmatpush3.bf16.msra.mxu0 %v4707_v29  ;;  %4275 = vmatpush3.bf16.msra.mxu1 %v4708_v30 }
  0x1c   :  { %4254 = vmatprep.subr.bf16.mxu0 %v4709_v31  ;;  %4276 = vmatprep.subr.bf16.mxu1 %v4710_v32 }
  0x1f   :  { %4255 = vmatpush3.bf16.msra.mxu0 %v4711_v33  ;;  %4277 = vmatpush3.bf16.msra.mxu1 %v4712_v34 }
  0x20   :  { %4256 = vmatprep.subr.bf16.mxu0 %v4713_v35  ;;  %4278 = vmatprep.subr.bf16.mxu1 %v4714_v36 }
  0x23   :  { %4257 = vmatpush3.bf16.msra.mxu0 %v4715_v37  ;;  %4279 = vmatpush3.bf16.msra.mxu1 %v4716_v38 }
  0x24   :  { %4258 = vmatprep.subr.bf16.mxu0 %v4717_v39  ;;  %4280 = vmatprep.subr.bf16.mxu1 %v4718_v40 }
  0x27   :  { %4259 = vmatpush3.bf16.msra.mxu0 %v4719_v41  ;;  %4281 = vmatpush3.bf16.msra.mxu1 %v4720_v42 }
  0x28   :  { %4622 = vmatprep.subr.bf16.mxu0 %v4949_v43  ;;  %4625 = vmatprep.subr.bf16.mxu1 %v4949_v43 }
  0x29   :  { %20 = vsyncpa [#allocation5], 0  ;;  %v58_v44 = vlaneseq  ;;  %v56_v48 = vld [vmem:[%s6010_s2] sm:$0xf]  ;;  %v556_v13 = vld [vmem:[%s6014_s6 + $0x8] sm:$0xff]  ;;  %vm4950_vm1 = vmmov 0  }
  0x2a   :  { %v555_v12 = vld [vmem:[%s6014_s6] sm:$0xff]  ;;  %v4951_v15 = vmov 0.0   ;;  %vm557_vm2 = vcmask 130048   ;;  %vm640_vm3 = vcmask 523264   ;;  %s4924_s14 = scalar_lea.hbm %s6021_s13, 16 }
  0x2b   :  { %v59_v45 = vshrl.u32 %v58_v44, 7  ;;  %v4623_v14 = vpack.c.bf16 %v556_v13, %v555_v12  ;;  %v3687_v18 = vld [vmem:[%s6012_s4] ss:$0 sm:$0xff]  ;;  %v5190_v36 = vand.u32 127, %v58_v44  ;;  %v668_v44 = vld [vmem:[%s6013_s5 + $0x10] sm:$0xff]  ;;  %v4730_v12 = vld [vmem:[%s6018_s10 + $0x8] sm:$0xff]   ;;  %p4925_p0 = scmp.ne.s32.totalorder %s6021_s13, %s4924_s14  ;;  %p4928_p1 = scmp.lt.u32.totalorder %s4924_s14, %s6021_s13 }
  0x2c   :  { %v631_v29 = vld [vmem:[%s6015_s7] sm:$0x1]  ;;  %v4732_v13 = vld [vmem:[%s6018_s10 + $0x50] sm:$0xff]  }
  0x2d   :  { %v5154_v46 = vsub.s32 0, %v59_v45  ;;  %v5156_v47 = vsub.s32 2, %v59_v45  ;;  %v5161_v49 = vsub.s32 1, %v59_v45  ;;  %v5163_v50 = vsub.s32 3, %v59_v45  ;;  %v666_v42 = vld [vmem:[%s6013_s5] sm:$0xff]  ;;  %v667_v45 = vld [vmem:[%s6013_s5 + $0x8] sm:$0xff]  ;;  %p4930_p2 = pnand %p4928_p1, %p4925_p0 }
  0x2e   :  { %v632_v30 = vmul.f32 0.5, %v631_v29  ;;  %v4737_v29 = vld [vmem:[%s6018_s10 + $0x88] sm:$0xff]  }
  0x2f   :  { %v61_v51 = vrot.slane %v56_v48, %v5154_v46  ;;  %v69_v52 = vrot.slane %v56_v48, %v5156_v47  ;;  %v65_v53 = vrot.slane %v56_v48, %v5161_v49  ;;  %v73_v54 = vrot.slane %v56_v48, %v5163_v50 }
  0x30   :  { %v637_v31 = vrot.slane %v632_v30, %v5154_v46  ;;  %v4626_v48 = vpack.c.bf16 %v667_v45, %v666_v42  ;;  %v4739_v30 = vld [vmem:[%s6018_s10 + $0xd0] sm:$0xff]   ;;  %v4754_v42 = vld [vmem:[%s6018_s10 + $0x38] sm:$0xff]  }
  0x31   :  { %v4755_v45 = vld [vmem:[%s6018_s10 + $0xf0] sm:$0xff]  }
  0xdd   :  { %v156_v55 = vpop.f32.mrb[0].mxu0  ;;  %v197_v56 = vpop.f32.mrb[0].mxu1 }
  0xde   :  { %v157_v57 = vadd.f32 %v156_v55, %v61_v51  ;;  %v198_v58 = vadd.f32 %v197_v56, %v69_v52  ;;  %v158_v59 = vpop.f32.mrb[1].mxu0  ;;  %v199_v60 = vpop.f32.mrb[1].mxu1  ;;  %v669_v51 = vld [vmem:[%s6013_s5 + $0x18] sm:$0xff] }
  0xdf   :  { %v159_v61 = vadd.f32 %v158_v59, %v65_v53  ;;  %v200_v62 = vadd.f32 %v199_v60, %v73_v54  ;;  %v160_v63 = vpop.f32.mrb[2].mxu0  ;;  %v201_v0 = vpop.f32.mrb[2].mxu1  ;;  %v4629_v52 = vpack.c.bf16 %v669_v51, %v668_v44  ;;  %v670_v53 = vld [vmem:[%s6013_s5 + $0x20] sm:$0xff]  ;;  %v671_v54 = vld [vmem:[%s6013_s5 + $0x28] sm:$0xff]  ;;  %v672_v60 = vld [vmem:[%s6013_s5 + $0x30] sm:$0xff] }
  0xe0   :  { %v204_v1 = vmax.f32 %v157_v57, 0.0  ;;  %v206_v3 = vmax.f32 %v198_v58, 0.0  ;;  %v161_v4 = vpop.f32.mrb[3].mxu0  ;;  %v202_v5 = vpop.f32.mrb[3].mxu1  ;;  %v4632_v55 = vpack.c.bf16 %v671_v54, %v670_v53  ;;  %v4721_v63 = vld [vmem:[%s6016_s8] ss:$16 sps:$4 sm:$0xff]  }
  0xe1   :  { %v205_v6 = vmax.f32 %v159_v61, 0.0  ;;  %v207_v7 = vmax.f32 %v200_v62, 0.0  ;;  %v673_v61 = vld [vmem:[%s6013_s5 + $0x38] sm:$0xff]  ;;  %v4723_v0 = vld [vmem:[%s6016_s8 + $0x4] ss:$16 sps:$4 sm:$0xff]  }
  0xe2   :  { %v210_v8 = vpack.c.bf16 %v206_v3, %v206_v3  ;;  %v208_v11 = vpack.c.bf16 %v204_v1, %v204_v1  ;;  %v4635_v62 = vpack.c.bf16 %v673_v61, %v672_v60  ;;  %v4756_v44 = vld [vmem:[%s6018_s10 + $0xb0] sm:$0xff]   ;;  %v4760_v51 = vld [vmem:[%s6018_s10 + $0xf8] sm:$0xff]   ;;  %v752_v54 = vld [vmem:[%s6017_s9] sm:$0xf] }
  0xe3   :  { %v209_v9 = vpack.c.bf16 %v205_v6, %v205_v6  ;;  %v211_v10 = vpack.c.bf16 %v207_v7, %v207_v7  ;;  %v4767_v53 = vld [vmem:[%s6009_s1 + $0x4c] ss:$16 sps:$4 sm:$0xff]  }
  0xe5   :  { %507 = vmatprep.mubr.bf16.mxu0 %v209_v9  ;;  %547 = vmatprep.mubr.bf16.mxu1 %v211_v10  ;;  %v4727_v9 = vld [vmem:[%s6018_s10 + $0x40] sm:$0xff]  }
  0xe6   :  { %508 = vmatmul.mubr.bf16.vlgmr.msra.gmra.mrb[4].mxu0 %v208_v11  ;;  %548 = vmatmul.mubr.bf16.vlgmr.msra.gmra.mrb[4].mxu1 %v210_v8  ;;  %v4726_v8 = vld [vmem:[%s6016_s8 + $0xc] ss:$16 sps:$4 sm:$0xff]   ;;  %v4728_v10 = vld [vmem:[%s6018_s10] sm:$0xff]  }
  0xe7   :  { %4624 = vmatpush3.bf16.msra.mxu0 %v4623_v14  ;;  %4548 = vmatprep.mubr.msk.f32.mxu0 %vm4950_vm1, %v4951_v15  ;;  %v4729_v11 = vld [vmem:[%s6018_s10 + $0x48] sm:$0xff]   ;;  %v4734_v14 = vld [vmem:[%s6018_s10 + $0x10] sm:$0xff]  }
  0xe8   :  { %4567 = vmatprep.mubr.msk.f32.mxu1 %vm4950_vm1, %v4951_v15  ;;  %4627 = vmatpush3.bf16.msra.mxu1 %v4626_v48  ;;  %v4759_v48 = vld [vmem:[%s6009_s1 + $0x44] ss:$16 sps:$4 sm:$0xff]  }
  0xe9   :  { %4628 = vmatprep.subr.bf16.mxu1 %v4949_v43  ;;  %797 = vmatprep.subr.bf16.mxu0 %v4723_v0 }
  0xec   :  { %4630 = vmatpush3.bf16.msra.mxu1 %v4629_v52  ;;  %v4761_v52 = vld [vmem:[%s6018_s10 + $0xb8] sm:$0xff]  }
  0xed   :  { %4631 = vmatprep.subr.bf16.mxu1 %v4949_v43 }
  0xf0   :  { %4633 = vmatpush3.bf16.msra.mxu1 %v4632_v55  ;;  %v757_v55 = vrot.slane %v752_v54, %v5154_v46 }
  0xf1   :  { %4634 = vmatprep.subr.bf16.mxu1 %v4949_v43 }
  0xf4   :  { %4636 = vmatpush3.bf16.msra.mxu1 %v4635_v62 }
  0xf5   :  { %4300 = vmatprep.subr.bf16.mxu1 %v4727_v9 }
 0x1b9   :  { %v4260_v16 = vpop.f32.mrb[4].mxu0  ;;  %v4282_v17 = vpop.f32.mrb[4].mxu1 }
 0x1ba   :  { %v4261_v19 = vpop.f32.mrb[5].mxu0  ;;  %v4283_v20 = vpop.f32.mrb[5].mxu1 }
 0x1bb   :  { %v4262_v21 = vadd.f32 %v4261_v19, %v4260_v16  ;;  %v4284_v22 = vadd.f32 %v4283_v20, %v4282_v17  ;;  %v4263_v23 = vpop.f32.mrb[6].mxu0  ;;  %v4285_v24 = vpop.f32.mrb[6].mxu1  ;;  %v4736_v16 = vld [vmem:[%s6018_s10 + $0x58] sm:$0xff]   ;;  %v4742_v19 = vld [vmem:[%s6018_s10 + $0x20] sm:$0xff]   ;;  %v4744_v20 = vld [vmem:[%s6018_s10 + $0x68] sm:$0xff]  }
 0x1bc   :  { %v4264_v25 = vpop.f32.mrb[7].mxu0  ;;  %v4286_v26 = vpop.f32.mrb[7].mxu1  ;;  %v4738_v17 = vld [vmem:[%s6018_s10 + $0x18] sm:$0xff]  }
 0x1bd   :  { %v510_v27 = vadd.f32 %v4262_v21, %v3687_v18  ;;  %v4740_v18 = vld [vmem:[%s6018_s10 + $0x60] sm:$0xff]   ;;  %v4746_v21 = vld [vmem:[%s6018_s10 + $0x28] sm:$0xff]  }
 0x1be   :  { %v4724_v23 = vld [vmem:[%s6016_s8 + $0x8] ss:$16 sps:$4 sm:$0xff]   ;;  %v4731_v26 = vld [vmem:[%s6018_s10 + $0xc0] sm:$0xff]  }
 0x1bf   :  { %v550_v28 = vadd.f32 %v4284_v22, %v510_v27  ;;  %v4733_v27 = vld [vmem:[%s6018_s10 + $0x80] sm:$0xff]  }
 0x1c1   :  { %4549 = vmatmul.mubr.msk.f32.vlgmr.msra.gmra.mrb[8].mxu0 %vm557_vm2, %v550_v28  ;;  %v4735_v28 = vld [vmem:[%s6018_s10 + $0xc8] sm:$0xff]  }
 0x1c2   :  { %829 = vmatprep.mubr.bf16.mxu0 %v4948_v2  ;;  %798 = vmatpush1.bf16.msra.mxu0 %v4721_v63 }
 0x1c3   :  { %838 = vmatprep.subr.bf16.mxu0 %v4726_v8 }
 0x294   :  { %v627_v32 = vpop.f32.mrb[8].mxu0 }
 0x295   :  { %v639_v33 = vsub.f32 %v627_v32, %v637_v31  ;;  %v4550_v34 = vpop.f32.mrb[9].mxu0  ;;  %v4741_v31 = vld [vmem:[%s6018_s10 + $0x90] sm:$0xff]   ;;  %v4743_v32 = vld [vmem:[%s6018_s10 + $0xd8] sm:$0xff]  }
 0x296   :  { %v4747_v34 = vld [vmem:[%s6018_s10 + $0xe0] sm:$0xff]  }
 0x297   :  { %v641_v35 = vsel %vm640_vm3, %v639_v33, -inf }
 0x298   :  { %642 = vmax.xlane.f32.xlu0 %v641_v35  ;;  %v4748_v35 = vld [vmem:[%s6018_s10 + $0x70] sm:$0xff]  }
 0x325   :  { %v643_v37 = vpop.xlane.xlu0 %642 }
 0x326   :  { %vm646_vm4 = vcmp.ge.f32.partialorder %v639_v33, %v643_v37  ;;  %v4745_v33 = vld [vmem:[%s6018_s10 + $0x98] sm:$0xff]   ;;  %v4749_v37 = vld [vmem:[%s6018_s10 + $0xa0] sm:$0xff]  }
 0x327   :  { %v647_v38 = vsel %vm646_vm4, %v5190_v36, 64 }
 0x328   :  { %v648_v39 = vsel %vm640_vm3, %v647_v38, 2147483647  ;;  %v4750_v38 = vld [vmem:[%s6018_s10 + $0x30] sm:$0xff]  }
 0x329   :  { %v650_v40 = vshra.s32 %v648_v39, 16  ;;  %v649_v56 = vand.u32 65535, %v648_v39  ;;  %v4751_v39 = vld [vmem:[%s6018_s10 + $0xe8] sm:$0xff]  }
 0x32b   :  { %v652_v41 = vcvt.s32.f32 %v650_v40  ;;  %v651_v58 = vcvt.s32.f32 %v649_v56  ;;  %v4752_v40 = vld [vmem:[%s6018_s10 + $0x78] sm:$0xff]   ;;  %v761_v56 = vrot.slane %v752_v54, %v5161_v49 }
 0x32d   :  { %653 = vmin.xlane.f32.xlu0 %v652_v41 }
 0x3ba   :  { %v654_v57 = vpop.xlane.xlu0 %653 }
 0x3bb   :  { %vm655_vm5 = vcmp.eq.f32.partialorder %v652_v41, %v654_v57  ;;  %v660_v1 = vcvt.f32.s32 %v654_v57  ;;  %v4753_v41 = vld [vmem:[%s6018_s10 + $0xa8] sm:$0xff]  }
 0x3bc   :  { %v656_v59 = vsel %vm655_vm5, %v651_v58, inf }
 0x3bd   :  { %657 = vmin.xlane.f32.xlu1 %v656_v59  ;;  %v661_v4 = vshll.u32 %v660_v1, 16  ;;  %v765_v1 = vrot.slane %v752_v54, %v5156_v47 }
 0x44a   :  { %v658_v3 = vpop.xlane.xlu1 %657 }
 0x44b   :  { %v659_v5 = vcvt.f32.s32 %v658_v3 }
 0x44d   :  { %v662_v6 = vadd.s32 %v661_v4, %v659_v5  ;;  %v769_v4 = vrot.slane %v752_v54, %v5163_v50  ;;  %v4757_v5 = vld [vmem:[%s6009_s1 + $0x40] ss:$16 sps:$4 sm:$0xff]  }
 0x44e   :  { %v4794_v54 = vld [vmem:[%s6011_s3 + $0x130] sm:$0xff]  }
 0x44f   :  { %vm663_vm6 = vcmp.eq.s32.totalorder %v5190_v36, %v662_v6 }
 0x450   :  { %v3721_v7 = vsel %vm663_vm6, 1.0, %v4951_v15 }
 0x451   :  { %4568 = vmatmul.mubr.msk.f32.vlgmr.msra.gmra.mrb[8].mxu1 %vm640_vm3, %v3721_v7  ;;  %v4764_v7 = vld [vmem:[%s6009_s1 + $0x64] ss:$16 sps:$4 sm:$0xff]  }
 0x452   :  { %4301 = vmatpush3.bf16.msra.mxu1 %v4728_v10 }
 0x453   :  { %4302 = vmatprep.subr.bf16.mxu1 %v4729_v11 }
 0x456   :  { %4303 = vmatpush3.bf16.msra.mxu1 %v4730_v12 }
 0x457   :  { %4304 = vmatprep.subr.bf16.mxu1 %v4732_v13  ;;  %v4762_v13 = vld [vmem:[%s6009_s1 + $0x60] ss:$16 sps:$4 sm:$0xff]  }
 0x45a   :  { %4305 = vmatpush3.bf16.msra.mxu1 %v4734_v14  ;;  %v5361_v14 = vld [vmem:[%s6008_s0 + $0x8] sm:$0xff] }
 0x45b   :  { %4306 = vmatprep.subr.bf16.mxu1 %v4736_v16 }
 0x45e   :  { %4307 = vmatpush3.bf16.msra.mxu1 %v4738_v17 }
 0x45f   :  { %4308 = vmatprep.subr.bf16.mxu1 %v4740_v18  ;;  %v4771_v18 = vld [vmem:[%s6011_s3 + $0x140] sm:$0xff]  }
 0x462   :  { %4309 = vmatpush3.bf16.msra.mxu1 %v4742_v19 }
 0x463   :  { %4310 = vmatprep.subr.bf16.mxu1 %v4744_v20  ;;  %v1235_v20 = vpack.c.bf16 %v5361_v14, %v5361_v14 }
 0x466   :  { %4311 = vmatpush3.bf16.msra.mxu1 %v4746_v21 }
 0x467   :  { %4312 = vmatprep.subr.bf16.mxu1 %v4748_v35  ;;  %v4781_v35 = vld [vmem:[%s6011_s3 + $0x188] sm:$0xff]  }
 0x46a   :  { %4313 = vmatpush3.bf16.msra.mxu1 %v4750_v38  ;;  %v4783_v38 = vld [vmem:[%s6011_s3 + $0x1d0] sm:$0xff]  }
 0x46b   :  { %4314 = vmatprep.subr.bf16.mxu1 %v4752_v40  ;;  %v4785_v40 = vld [vmem:[%s6011_s3 + $0x190] sm:$0xff]  }
 0x46e   :  { %4315 = vmatpush3.bf16.msra.mxu1 %v4754_v42  ;;  %v4787_v42 = vld [vmem:[%s6011_s3 + $0x1d8] sm:$0xff]  }
 0x46f   :  { %1311 = vmatprep.subr.bf16.mxu1 %v4759_v48  ;;  %v4790_v48 = vld [vmem:[%s6011_s3 + $0x128] sm:$0xff]  }
 0x524   :  { %v743_v22 = vpop.f32.mrb[8].mxu1 }
 0x525   :  { %v747_v24 = vpack.c.bf16 %v743_v22, %v743_v22  ;;  %v4569_v25 = vpop.f32.mrb[9].mxu1  ;;  %v4765_v22 = vld [vmem:[%s6009_s1 + $0x48] ss:$16 sps:$4 sm:$0xff]  }
 0x526   :  { %v4772_v25 = vld [vmem:[%s6011_s3 + $0x100] sm:$0xff]  }
 0x527   :  { %3727 = vmatmul.mubr.msk.bf16.vlgmr.msra.gmra.mrb[12].mxu0 %vm557_vm2, %v747_v24 }
 0x528   :  { %839 = vmatpush1.bf16.msra.mxu0 %v4724_v23  ;;  %870 = vmatprep.mubr.bf16.mxu0 %v4948_v2 }
 0x529   :  { %4322 = vmatprep.subr.bf16.mxu0 %v4731_v26  ;;  %v4773_v26 = vld [vmem:[%s6011_s3 + $0x148] sm:$0xff]  }
 0x52f   :  { %3728 = vmatmul.mubr.msk.bf16.vlgmr.msra.gmra.mrb[16].mxu0 %vm557_vm2, %v747_v24  ;;  %v4770_v24 = vld [vmem:[%s6009_s1 + $0x6c] ss:$16 sps:$4 sm:$0xff]  }
 0x530   :  { %4323 = vmatpush3.bf16.msra.mxu0 %v4733_v27  ;;  %v4768_v27 = vld [vmem:[%s6009_s1 + $0x68] ss:$16 sps:$4 sm:$0xff]  }
 0x531   :  { %4324 = vmatprep.subr.bf16.mxu0 %v4735_v28  ;;  %v4774_v28 = vld [vmem:[%s6011_s3 + $0x108] sm:$0xff]  }
 0x534   :  { %4325 = vmatpush3.bf16.msra.mxu0 %v4737_v29  ;;  %v4775_v29 = vld [vmem:[%s6011_s3 + $0x1c0] sm:$0xff]  }
 0x535   :  { %4326 = vmatprep.subr.bf16.mxu0 %v4739_v30  ;;  %v4776_v30 = vld [vmem:[%s6011_s3 + $0x150] sm:$0xff]  }
 0x538   :  { %4327 = vmatpush3.bf16.msra.mxu0 %v4741_v31  ;;  %v4777_v31 = vld [vmem:[%s6011_s3 + $0x180] sm:$0xff]  }
 0x539   :  { %4328 = vmatprep.subr.bf16.mxu0 %v4743_v32  ;;  %v4778_v32 = vld [vmem:[%s6011_s3 + $0x110] sm:$0xff]  }
 0x53c   :  { %4329 = vmatpush3.bf16.msra.mxu0 %v4745_v33  ;;  %v4779_v33 = vld [vmem:[%s6011_s3 + $0x1c8] sm:$0xff]  }
 0x53d   :  { %4330 = vmatprep.subr.bf16.mxu0 %v4747_v34  ;;  %v4780_v34 = vld [vmem:[%s6011_s3 + $0x158] sm:$0xff]  }
 0x540   :  { %4331 = vmatpush3.bf16.msra.mxu0 %v4749_v37  ;;  %v4782_v37 = vld [vmem:[%s6011_s3 + $0x118] sm:$0xff]  }
 0x541   :  { %4332 = vmatprep.subr.bf16.mxu0 %v4751_v39  ;;  %v4784_v39 = vld [vmem:[%s6011_s3 + $0x160] sm:$0xff]  }
 0x544   :  { %4333 = vmatpush3.bf16.msra.mxu0 %v4753_v41  ;;  %v4786_v41 = vld [vmem:[%s6011_s3 + $0x120] sm:$0xff]  }
 0x545   :  { %4334 = vmatprep.subr.bf16.mxu0 %v4755_v45  ;;  %v4788_v45 = vld [vmem:[%s6011_s3 + $0x168] sm:$0xff]  }
 0x548   :  { %4335 = vmatpush3.bf16.msra.mxu0 %v4756_v44  ;;  %v4789_v44 = vld [vmem:[%s6011_s3 + $0x198] sm:$0xff]  }
 0x549   :  { %4336 = vmatprep.subr.bf16.mxu0 %v4760_v51  ;;  %v4791_v51 = vld [vmem:[%s6011_s3 + $0x1e0] sm:$0xff]  }
 0x54c   :  { %4337 = vmatpush3.bf16.msra.mxu0 %v4761_v52  ;;  %v4792_v52 = vld [vmem:[%s6011_s3 + $0x170] sm:$0xff]  }
 0x54d   :  { %1352 = vmatprep.subr.bf16.mxu0 %v4767_v53  ;;  %v4793_v53 = vld [vmem:[%s6011_s3 + $0x1a0] sm:$0xff]  }
 0x5fa   :  { %v831_v57 = vpop.f32.mrb[12].mxu0 }
 0x5fb   :  { %v832_v58 = vadd.f32 %v831_v57, %v757_v55  ;;  %v833_v59 = vpop.f32.mrb[13].mxu0  ;;  %v4795_v55 = vld [vmem:[%s6011_s3 + $0x1e8] sm:$0xff]  }
 0x5fc   :  { %v834_v60 = vadd.f32 %v833_v59, %v761_v56  ;;  %v835_v61 = vpop.f32.mrb[14].mxu0  ;;  %v4796_v56 = vld [vmem:[%s6011_s3 + $0x178] sm:$0xff]   ;;  %v4797_v57 = vld [vmem:[%s6011_s3 + $0x1a8] sm:$0xff]   ;;  %v4799_v59 = vld [vmem:[%s6011_s3 + $0x1f0] sm:$0xff]  }
 0x5fd   :  { %v879_v62 = vmax.f32 %v832_v58, 0.0  ;;  %v836_v63 = vpop.f32.mrb[15].mxu0  ;;  %v4798_v58 = vld [vmem:[%s6011_s3 + $0x138] sm:$0xff]  }
 0x5fe   :  { %v880_v0 = vmax.f32 %v834_v60, 0.0  ;;  %v4800_v60 = vld [vmem:[%s6011_s3 + $0x1b0] sm:$0xff]   ;;  %v4801_v61 = vld [vmem:[%s6011_s3 + $0x1f8] sm:$0xff]  }
 0x5ff   :  { %v883_v6 = vpack.c.bf16 %v879_v62, %v879_v62  ;;  %v4802_v62 = vld [vmem:[%s6011_s3 + $0x1b8] sm:$0xff]  }
 0x600   :  { %v884_v3 = vpack.c.bf16 %v880_v0, %v880_v0 }
 0x602   :  { %v872_v8 = vpop.f32.mrb[16].mxu0  ;;  %1182 = vmatprep.mubr.bf16.mxu1 %v884_v3 }
 0x603   :  { %v873_v9 = vadd.f32 %v872_v8, %v765_v1  ;;  %v874_v10 = vpop.f32.mrb[17].mxu0  ;;  %1183 = vmatmul.mubr.bf16.vlgmr.msra.gmra.mrb[12].mxu1 %v883_v6  ;;  %v3729_v8 = vld [vmem:[%s6019_s11] ss:$0 sm:$0xff] }
 0x604   :  { %v875_v11 = vadd.f32 %v874_v10, %v769_v4  ;;  %v876_v12 = vpop.f32.mrb[18].mxu0  ;;  %1312 = vmatpush1.bf16.msra.mxu1 %v4757_v5  ;;  %1343 = vmatprep.mubr.bf16.mxu1 %v4948_v2  ;;  %v3771_v4 = vld [vmem:[%s6010_s2 + $0x4] sm:$0xf] }
 0x605   :  { %v881_v16 = vmax.f32 %v873_v9, 0.0  ;;  %v877_v17 = vpop.f32.mrb[19].mxu0  ;;  %1313 = vmatprep.subr.bf16.mxu1 %v4764_v7  ;;  %v1251_v6 = vrot.slane %v3771_v4, %v5154_v46  ;;  %v1255_v7 = vrot.slane %v3771_v4, %v5161_v49 }
 0x606   :  { %v882_v19 = vmax.f32 %v875_v11, 0.0 }
 0x607   :  { %v885_v23 = vpack.c.bf16 %v881_v16, %v881_v16 }
 0x608   :  { %v886_v21 = vpack.c.bf16 %v882_v19, %v882_v19  ;;  %1314 = vmatpush1.bf16.msra.mxu1 %v4762_v13 }
 0x609   :  { %4344 = vmatprep.subr.bf16.mxu1 %v4771_v18 }
 0x60a   :  { %1222 = vmatprep.mubr.bf16.mxu0 %v886_v21 }
 0x60b   :  { %1223 = vmatmul.mubr.bf16.vlgmr.msra.gmra.mrb[20].mxu0 %v885_v23  ;;  %3780 = vmatmul.mubr.msk.bf16.vlgmr.msra.gmra.mrb[16].mxu1 %vm118_vm0, %v1235_v20 }
 0x60c   :  { %1353 = vmatpush1.bf16.msra.mxu0 %v4765_v22  ;;  %1384 = vmatprep.mubr.bf16.mxu0 %v4948_v2 }
 0x60d   :  { %1354 = vmatprep.subr.bf16.mxu0 %v4770_v24  ;;  %4345 = vmatpush3.bf16.msra.mxu1 %v4772_v25 }
 0x60e   :  { %4346 = vmatprep.subr.bf16.mxu1 %v4773_v26 }
 0x610   :  { %1355 = vmatpush1.bf16.msra.mxu0 %v4768_v27  ;;  %v1259_v27 = vrot.slane %v3771_v4, %v5156_v47 }
 0x611   :  { %4347 = vmatpush3.bf16.msra.mxu1 %v4774_v28  ;;  %4366 = vmatprep.subr.bf16.mxu0 %v4775_v29  ;;  %v1263_v29 = vrot.slane %v3771_v4, %v5163_v50 }
 0x612   :  { %4348 = vmatprep.subr.bf16.mxu1 %v4776_v30 }
 0x613   :  { %3781 = vmatmul.mubr.msk.bf16.vlgmr.msra.gmra.mrb[24].mxu0 %vm118_vm0, %v1235_v20 }
 0x614   :  { %4367 = vmatpush3.bf16.msra.mxu0 %v4777_v31 }
 0x615   :  { %4349 = vmatpush3.bf16.msra.mxu1 %v4778_v32  ;;  %4368 = vmatprep.subr.bf16.mxu0 %v4779_v33 }
 0x616   :  { %4350 = vmatprep.subr.bf16.mxu1 %v4780_v34 }
 0x618   :  { %4369 = vmatpush3.bf16.msra.mxu0 %v4781_v35 }
 0x619   :  { %4351 = vmatpush3.bf16.msra.mxu1 %v4782_v37  ;;  %4370 = vmatprep.subr.bf16.mxu0 %v4783_v38 }
 0x61a   :  { %4352 = vmatprep.subr.bf16.mxu1 %v4784_v39 }
 0x61c   :  { %4371 = vmatpush3.bf16.msra.mxu0 %v4785_v40 }
 0x61d   :  { %4353 = vmatpush3.bf16.msra.mxu1 %v4786_v41  ;;  %4372 = vmatprep.subr.bf16.mxu0 %v4787_v42  ;;  %v3880_v41 = vld [vmem:[%s6014_s6 + $0x10] sm:$0xff]  ;;  %v3881_v42 = vld [vmem:[%s6014_s6 + $0x18] sm:$0xff] }
 0x61e   :  { %4354 = vmatprep.subr.bf16.mxu1 %v4788_v45  ;;  %v4638_v45 = vpack.c.bf16 %v3881_v42, %v3880_v41  ;;  %v4810_v41 = vld [vmem:[%s6018_s10 + $0x100] sm:$0xff]   ;;  %v4811_v42 = vld [vmem:[%s6018_s10 + $0x148] sm:$0xff]  }
 0x620   :  { %4373 = vmatpush3.bf16.msra.mxu0 %v4789_v44 }
 0x621   :  { %4355 = vmatpush3.bf16.msra.mxu1 %v4790_v48  ;;  %4374 = vmatprep.subr.bf16.mxu0 %v4791_v51 }
 0x622   :  { %4356 = vmatprep.subr.bf16.mxu1 %v4792_v52 }
 0x624   :  { %4375 = vmatpush3.bf16.msra.mxu0 %v4793_v53 }
 0x625   :  { %4357 = vmatpush3.bf16.msra.mxu1 %v4794_v54  ;;  %4376 = vmatprep.subr.bf16.mxu0 %v4795_v55  ;;  %v3847_v54 = vld [vmem:[%s6012_s4 + $0x1] ss:$0 sm:$0xff] }
 0x626   :  { %4358 = vmatprep.subr.bf16.mxu1 %v4796_v56 }
 0x628   :  { %4377 = vmatpush3.bf16.msra.mxu0 %v4797_v57 }
 0x629   :  { %4359 = vmatpush3.bf16.msra.mxu1 %v4798_v58  ;;  %4378 = vmatprep.subr.bf16.mxu0 %v4799_v59 }
 0x62a   :  { %4637 = vmatprep.subr.bf16.mxu1 %v4949_v43 }
 0x62c   :  { %4379 = vmatpush3.bf16.msra.mxu0 %v4800_v60 }
 0x62d   :  { %4380 = vmatprep.subr.bf16.mxu0 %v4801_v61 }
 0x630   :  { %4381 = vmatpush3.bf16.msra.mxu0 %v4802_v62  ;;  %v3883_v62 = vld [vmem:[%s6015_s7 + $0x1] sm:$0x1] }
 0x631   :  { %4640 = vmatprep.subr.bf16.mxu0 %v4949_v43 }
 0x6d6   :  { %v4316_v63 = vpop.f32.mrb[12].mxu1 }
 0x6d7   :  { %v4317_v0 = vpop.f32.mrb[13].mxu1 }
 0x6d8   :  { %v4318_v1 = vadd.f32 %v4317_v0, %v4316_v63  ;;  %v4319_v3 = vpop.f32.mrb[14].mxu1  ;;  %v1824_v63 = vmul.f32 0.5, %v3883_v62  ;;  %v4815_v62 = vld [vmem:[%s6018_s10 + $0x180] sm:$0xff]  }
 0x6d9   :  { %v4320_v5 = vpop.f32.mrb[15].mxu1 }
 0x6da   :  { %v1185_v16 = vadd.f32 %v4318_v1, %v3729_v8  ;;  %v1829_v0 = vrot.slane %v1824_v63, %v5154_v46  ;;  %v4817_v63 = vld [vmem:[%s6018_s10 + $0x1c8] sm:$0xff]  }
 0x6de   :  { %v4338_v9 = vpop.f32.mrb[20].mxu0  ;;  %v1345_v10 = vpop.f32.mrb[16].mxu1 }
 0x6df   :  { %v4339_v11 = vpop.f32.mrb[21].mxu0  ;;  %v1346_v12 = vadd.f32 %v1345_v10, %v1251_v6  ;;  %v1347_v13 = vpop.f32.mrb[17].mxu1 }
 0x6e0   :  { %v4340_v17 = vadd.f32 %v4339_v11, %v4338_v9  ;;  %v4341_v18 = vpop.f32.mrb[22].mxu0  ;;  %v1348_v19 = vadd.f32 %v1347_v13, %v1255_v7  ;;  %v1349_v20 = vpop.f32.mrb[18].mxu1  ;;  %v3885_v11 = vld [vmem:[%s6013_s5 + $0x40] sm:$0xff]  ;;  %v3887_v13 = vld [vmem:[%s6013_s5 + $0x50] sm:$0xff] }
 0x6e1   :  { %v1393_v21 = vmax.f32 %v1346_v12, 0.0  ;;  %v4342_v22 = vpop.f32.mrb[23].mxu0  ;;  %v1350_v23 = vpop.f32.mrb[19].mxu1  ;;  %v3886_v12 = vld [vmem:[%s6013_s5 + $0x48] sm:$0xff] }
 0x6e2   :  { %v5483_v24 = vadd.f32 %v4340_v17, %v1185_v16  ;;  %v1394_v25 = vmax.f32 %v1348_v19, 0.0  ;;  %v4641_v16 = vpack.c.bf16 %v3886_v12, %v3885_v11  ;;  %v3888_v17 = vld [vmem:[%s6013_s5 + $0x58] sm:$0xff]  ;;  %v3889_v19 = vld [vmem:[%s6013_s5 + $0x60] sm:$0xff]  ;;  %v3890_v20 = vld [vmem:[%s6013_s5 + $0x68] sm:$0xff] }
 0x6e3   :  { %v1397_v26 = vpack.c.bf16 %v1393_v21, %v1393_v21  ;;  %v4644_v18 = vpack.c.bf16 %v3888_v17, %v3887_v13  ;;  %v4647_v21 = vpack.c.bf16 %v3890_v20, %v3889_v19  ;;  %v4834_v11 = vld [vmem:[%s6018_s10 + $0x178] sm:$0xff]   ;;  %v4835_v12 = vld [vmem:[%s6018_s10 + $0x1a8] sm:$0xff]   ;;  %v4838_v17 = vld [vmem:[%s6018_s10 + $0x1b0] sm:$0xff]  }
 0x6e4   :  { %v1398_v28 = vpack.c.bf16 %v1394_v25, %v1394_v25  ;;  %v4836_v13 = vld [vmem:[%s6018_s10 + $0x138] sm:$0xff]  }
 0x6e5   :  { %v4842_v19 = vld [vmem:[%s6018_s10 + $0x1f8] sm:$0xff]  }
 0x6e6   :  { %v1386_v30 = vpop.f32.mrb[24].mxu0  ;;  %1698 = vmatprep.mubr.bf16.mxu1 %v1398_v28  ;;  %v3892_v28 = vld [vmem:[%s6013_s5 + $0x78] sm:$0xff] }
 0x6e7   :  { %v1387_v31 = vadd.f32 %v1386_v30, %v1259_v27  ;;  %v1388_v32 = vpop.f32.mrb[25].mxu0  ;;  %1699 = vmatmul.mubr.bf16.vlgmr.msra.gmra.mrb[20].mxu1 %v1397_v26  ;;  %v3891_v27 = vld [vmem:[%s6013_s5 + $0x70] sm:$0xff]  ;;  %v4843_v20 = vld [vmem:[%s6018_s10 + $0x1b8] sm:$0xff]  }
 0x6e8   :  { %v1389_v33 = vadd.f32 %v1388_v32, %v1263_v29  ;;  %v1390_v34 = vpop.f32.mrb[26].mxu0  ;;  %4574 = vmatprep.mubr.msk.f32.mxu1 %vm4950_vm1, %v4951_v15  ;;  %4639 = vmatpush3.bf16.msra.mxu1 %v4638_v45  ;;  %v4650_v29 = vpack.c.bf16 %v3892_v28, %v3891_v27  ;;  %v4803_v30 = vld [vmem:[%s6016_s8 + $0x20] ss:$16 sps:$4 sm:$0xff]   ;;  %v4812_v45 = vld [vmem:[%s6018_s10 + $0x108] sm:$0xff]  }
 0x6e9   :  { %v1395_v35 = vmax.f32 %v1387_v31, 0.0  ;;  %v1391_v37 = vpop.f32.mrb[27].mxu0  ;;  %v4805_v31 = vld [vmem:[%s6016_s8 + $0x24] ss:$16 sps:$4 sm:$0xff]  }
 0x6ea   :  { %v1396_v38 = vmax.f32 %v1389_v33, 0.0  ;;  %1989 = vmatprep.subr.bf16.mxu1 %v4805_v31 }
 0x6eb   :  { %v1399_v40 = vpack.c.bf16 %v1395_v35, %v1395_v35 }
 0x6ec   :  { %v1400_v39 = vpack.c.bf16 %v1396_v38, %v1396_v38 }
 0x6ee   :  { %1738 = vmatprep.mubr.bf16.mxu0 %v1400_v39  ;;  %v4808_v39 = vld [vmem:[%s6016_s8 + $0x2c] ss:$16 sps:$4 sm:$0xff]  }
 0x6ef   :  { %1739 = vmatmul.mubr.bf16.vlgmr.msra.gmra.mrb[28].mxu0 %v1399_v40  ;;  %v4809_v40 = vld [vmem:[%s6018_s10 + $0x140] sm:$0xff]  }
 0x6f0   :  { %4593 = vmatprep.mubr.msk.f32.mxu0 %vm4950_vm1, %v4951_v15  ;;  %4642 = vmatpush3.bf16.msra.mxu0 %v4641_v16  ;;  %v4837_v16 = vld [vmem:[%s6018_s10 + $0x1f0] sm:$0xff]  }
 0x6f1   :  { %4643 = vmatprep.subr.bf16.mxu0 %v4949_v43 }
 0x6f4   :  { %4645 = vmatpush3.bf16.msra.mxu0 %v4644_v18  ;;  %v4841_v18 = vld [vmem:[%s6009_s1 + $0x84] ss:$16 sps:$4 sm:$0xff]  }
 0x6f5   :  { %4646 = vmatprep.subr.bf16.mxu0 %v4949_v43 }
 0x6f8   :  { %4648 = vmatpush3.bf16.msra.mxu0 %v4647_v21  ;;  %v4849_v21 = vld [vmem:[%s6009_s1 + $0x8c] ss:$16 sps:$4 sm:$0xff]  }
 0x6f9   :  { %4649 = vmatprep.subr.bf16.mxu0 %v4949_v43 }
 0x6fc   :  { %4651 = vmatpush3.bf16.msra.mxu0 %v4650_v29 }
 0x6fd   :  { %4400 = vmatprep.subr.bf16.mxu0 %v4809_v40  ;;  %v4846_v40 = vld [vmem:[%s6009_s1 + $0xa4] ss:$16 sps:$4 sm:$0xff]  }
 0x7ba   :  { %v4360_v44 = vpop.f32.mrb[20].mxu1 }
 0x7bb   :  { %v4361_v48 = vpop.f32.mrb[21].mxu1 }
 0x7bc   :  { %v4362_v51 = vadd.f32 %v4361_v48, %v4360_v44  ;;  %v4363_v52 = vpop.f32.mrb[22].mxu1  ;;  %v4814_v44 = vld [vmem:[%s6018_s10 + $0x150] sm:$0xff]  }
 0x7bd   :  { %v4364_v53 = vpop.f32.mrb[23].mxu1  ;;  %v4816_v48 = vld [vmem:[%s6018_s10 + $0x110] sm:$0xff]   ;;  %v4820_v52 = vld [vmem:[%s6018_s10 + $0x118] sm:$0xff]  }
 0x7be   :  { %v1701_v57 = vadd.f32 %v4362_v51, %v3847_v54  ;;  %v4818_v51 = vld [vmem:[%s6018_s10 + $0x158] sm:$0xff]   ;;  %v4822_v53 = vld [vmem:[%s6018_s10 + $0x160] sm:$0xff]  }
 0x7bf   :  { %v4824_v54 = vld [vmem:[%s6018_s10 + $0x120] sm:$0xff]  }
 0x7c2   :  { %v4382_v55 = vpop.f32.mrb[28].mxu0 }
 0x7c3   :  { %v4383_v56 = vpop.f32.mrb[29].mxu0 }
 0x7c4   :  { %v4384_v58 = vadd.f32 %v4383_v56, %v4382_v55  ;;  %v4385_v59 = vpop.f32.mrb[30].mxu0  ;;  %v4826_v55 = vld [vmem:[%s6018_s10 + $0x168] sm:$0xff]  }
 0x7c5   :  { %v4386_v60 = vpop.f32.mrb[31].mxu0  ;;  %v4828_v56 = vld [vmem:[%s6018_s10 + $0x128] sm:$0xff]  }
 0x7c6   :  { %v1741_v61 = vadd.f32 %v4384_v58, %v1701_v57  ;;  %v4806_v58 = vld [vmem:[%s6016_s8 + $0x28] ss:$16 sps:$4 sm:$0xff]  }
 0x7c8   :  { %4575 = vmatmul.mubr.msk.f32.vlgmr.msra.gmra.mrb[10].mxu1 %vm557_vm2, %v1741_v61  ;;  %v4813_v61 = vld [vmem:[%s6018_s10 + $0x1c0] sm:$0xff]  }
 0x7c9   :  { %2021 = vmatprep.mubr.bf16.mxu1 %v4948_v2  ;;  %1990 = vmatpush1.bf16.msra.mxu1 %v4803_v30 }
 0x7ca   :  { %2030 = vmatprep.subr.bf16.mxu1 %v4808_v39 }
 0x89b   :  { %v1818_v1 = vpop.f32.mrb[10].mxu1 }
 0x89c   :  { %v1831_v3 = vsub.f32 %v1818_v1, %v1829_v0  ;;  %v4576_v4 = vpop.f32.mrb[11].mxu1  ;;  %v4819_v0 = vld [vmem:[%s6018_s10 + $0x188] sm:$0xff]   ;;  %v4821_v1 = vld [vmem:[%s6018_s10 + $0x1d0] sm:$0xff]  }
 0x89d   :  { %v4825_v4 = vld [vmem:[%s6018_s10 + $0x1d8] sm:$0xff]  }
 0x89e   :  { %v1832_v5 = vsel %vm640_vm3, %v1831_v3, -inf }
 0x89f   :  { %1833 = vmax.xlane.f32.xlu1 %v1832_v5  ;;  %v4827_v5 = vld [vmem:[%s6018_s10 + $0x198] sm:$0xff]  }
 0x92c   :  { %v1834_v6 = vpop.xlane.xlu1 %1833 }
 0x92d   :  { %vm1835_vm7 = vcmp.ge.f32.partialorder %v1831_v3, %v1834_v6  ;;  %v4823_v3 = vld [vmem:[%s6018_s10 + $0x190] sm:$0xff]   ;;  %v4829_v6 = vld [vmem:[%s6018_s10 + $0x1e0] sm:$0xff]  }
 0x92e   :  { %v1836_v7 = vsel %vm1835_vm7, %v5190_v36, 64 }
 0x92f   :  { %v1837_v8 = vsel %vm640_vm3, %v1836_v7, 2147483647  ;;  %v4830_v7 = vld [vmem:[%s6018_s10 + $0x170] sm:$0xff]  }
 0x930   :  { %v1839_v9 = vshra.s32 %v1837_v8, 16  ;;  %v1838_v22 = vand.u32 65535, %v1837_v8  ;;  %v4831_v8 = vld [vmem:[%s6018_s10 + $0x1a0] sm:$0xff]  }
 0x932   :  { %v1841_v10 = vcvt.s32.f32 %v1839_v9  ;;  %v1840_v25 = vcvt.s32.f32 %v1838_v22  ;;  %v4832_v9 = vld [vmem:[%s6018_s10 + $0x130] sm:$0xff]   ;;  %v3898_v22 = vld [vmem:[%s6017_s9 + $0x4] sm:$0xf] }
 0x934   :  { %1842 = vmin.xlane.f32.xlu0 %v1841_v10 }
 0x9c1   :  { %v1843_v23 = vpop.xlane.xlu0 %1842 }
 0x9c2   :  { %vm1844_vm8 = vcmp.eq.f32.partialorder %v1841_v10, %v1843_v23  ;;  %v1849_v32 = vcvt.f32.s32 %v1843_v23  ;;  %v4833_v10 = vld [vmem:[%s6018_s10 + $0x1e8] sm:$0xff]   ;;  %v1949_v23 = vrot.slane %v3898_v22, %v5154_v46 }
 0x9c3   :  { %v1845_v26 = vsel %vm1844_vm8, %v1840_v25, inf  ;;  %v1953_v25 = vrot.slane %v3898_v22, %v5161_v49 }
 0x9c4   :  { %1846 = vmin.xlane.f32.xlu1 %v1845_v26  ;;  %v1850_v34 = vshll.u32 %v1849_v32, 16 }
 0xa51   :  { %v1847_v33 = vpop.xlane.xlu1 %1846 }
 0xa52   :  { %v1848_v35 = vcvt.f32.s32 %v1847_v33 }
 0xa54   :  { %v1851_v37 = vadd.s32 %v1850_v34, %v1848_v35  ;;  %v1957_v34 = vrot.slane %v3898_v22, %v5156_v47 }
 0xa56   :  { %vm1852_vm9 = vcmp.eq.s32.totalorder %v5190_v36, %v1851_v37  ;;  %v1961_v37 = vrot.slane %v3898_v22, %v5163_v50  ;;  %v4874_v22 = vld [vmem:[%s6011_s3 + $0x270] sm:$0xff]  }
 0xa57   :  { %v3884_v38 = vsel %vm1852_vm9, 1.0, %v4951_v15 }
 0xa58   :  { %4594 = vmatmul.mubr.msk.f32.vlgmr.msra.gmra.mrb[10].mxu0 %vm640_vm3, %v3884_v38  ;;  %v4839_v38 = vld [vmem:[%s6009_s1 + $0x80] ss:$16 sps:$4 sm:$0xff]  }
 0xa59   :  { %4401 = vmatpush3.bf16.msra.mxu0 %v4810_v41 }
 0xa5a   :  { %4402 = vmatprep.subr.bf16.mxu0 %v4811_v42 }
 0xa5d   :  { %4403 = vmatpush3.bf16.msra.mxu0 %v4812_v45 }
 0xa5e   :  { %4404 = vmatprep.subr.bf16.mxu0 %v4814_v44 }
 0xa61   :  { %4405 = vmatpush3.bf16.msra.mxu0 %v4816_v48 }
 0xa62   :  { %4406 = vmatprep.subr.bf16.mxu0 %v4818_v51  ;;  %v4844_v51 = vld [vmem:[%s6009_s1 + $0xa0] ss:$16 sps:$4 sm:$0xff]  }
 0xa65   :  { %4407 = vmatpush3.bf16.msra.mxu0 %v4820_v52  ;;  %v5676_v52 = vld [vmem:[%s6008_s0 + $0x10] sm:$0xff] }
 0xa66   :  { %4408 = vmatprep.subr.bf16.mxu0 %v4822_v53 }
 0xa69   :  { %4409 = vmatpush3.bf16.msra.mxu0 %v4824_v54 }
 0xa6a   :  { %4410 = vmatprep.subr.bf16.mxu0 %v4826_v55  ;;  %v4853_v55 = vld [vmem:[%s6011_s3 + $0x240] sm:$0xff]  }
 0xa6d   :  { %4411 = vmatpush3.bf16.msra.mxu0 %v4828_v56 }
 0xa6e   :  { %4412 = vmatprep.subr.bf16.mxu0 %v4830_v7  ;;  %v4861_v7 = vld [vmem:[%s6011_s3 + $0x2c8] sm:$0xff]  }
 0xa71   :  { %4413 = vmatpush3.bf16.msra.mxu0 %v4832_v9  ;;  %v4863_v9 = vld [vmem:[%s6011_s3 + $0x288] sm:$0xff]  }
 0xa72   :  { %4414 = vmatprep.subr.bf16.mxu0 %v4834_v11  ;;  %v4865_v11 = vld [vmem:[%s6011_s3 + $0x2d0] sm:$0xff]  }
 0xa75   :  { %4415 = vmatpush3.bf16.msra.mxu0 %v4836_v13  ;;  %v4867_v13 = vld [vmem:[%s6011_s3 + $0x290] sm:$0xff]  }
 0xa76   :  { %2505 = vmatprep.subr.bf16.mxu0 %v4841_v18  ;;  %v4870_v18 = vld [vmem:[%s6011_s3 + $0x268] sm:$0xff]  }
 0xb2b   :  { %v1933_v57 = vpop.f32.mrb[10].mxu0 }
 0xb2c   :  { %v1937_v59 = vpack.c.bf16 %v1933_v57, %v1933_v57  ;;  %v4595_v60 = vpop.f32.mrb[11].mxu0  ;;  %v2429_v57 = vpack.c.bf16 %v5676_v52, %v5676_v52 }
 0xb2e   :  { %3903 = vmatmul.mubr.msk.bf16.vlgmr.msra.gmra.mrb[24].mxu1 %vm557_vm2, %v1937_v59 }
 0xb2f   :  { %2031 = vmatpush1.bf16.msra.mxu1 %v4806_v58  ;;  %2062 = vmatprep.mubr.bf16.mxu1 %v4948_v2 }
 0xb30   :  { %4422 = vmatprep.subr.bf16.mxu1 %v4813_v61  ;;  %v4852_v61 = vld [vmem:[%s6009_s1 + $0xac] ss:$16 sps:$4 sm:$0xff]  }
 0xb36   :  { %3904 = vmatmul.mubr.msk.bf16.vlgmr.msra.gmra.mrb[28].mxu1 %vm557_vm2, %v1937_v59  ;;  %v4847_v59 = vld [vmem:[%s6009_s1 + $0x88] ss:$16 sps:$4 sm:$0xff]  }
 0xb37   :  { %4423 = vmatpush3.bf16.msra.mxu1 %v4815_v62  ;;  %v4854_v62 = vld [vmem:[%s6011_s3 + $0x200] sm:$0xff]  }
 0xb38   :  { %4424 = vmatprep.subr.bf16.mxu1 %v4817_v63  ;;  %v4855_v63 = vld [vmem:[%s6011_s3 + $0x248] sm:$0xff]  }
 0xb3b   :  { %4425 = vmatpush3.bf16.msra.mxu1 %v4819_v0  ;;  %v4850_v0 = vld [vmem:[%s6009_s1 + $0xa8] ss:$16 sps:$4 sm:$0xff]  }
 0xb3c   :  { %4426 = vmatprep.subr.bf16.mxu1 %v4821_v1  ;;  %v4856_v1 = vld [vmem:[%s6011_s3 + $0x208] sm:$0xff]  }
 0xb3f   :  { %4427 = vmatpush3.bf16.msra.mxu1 %v4823_v3  ;;  %v4857_v3 = vld [vmem:[%s6011_s3 + $0x2c0] sm:$0xff]  }
 0xb40   :  { %4428 = vmatprep.subr.bf16.mxu1 %v4825_v4  ;;  %v4858_v4 = vld [vmem:[%s6011_s3 + $0x250] sm:$0xff]  }
 0xb43   :  { %4429 = vmatpush3.bf16.msra.mxu1 %v4827_v5  ;;  %v4859_v5 = vld [vmem:[%s6011_s3 + $0x280] sm:$0xff]  }
 0xb44   :  { %4430 = vmatprep.subr.bf16.mxu1 %v4829_v6  ;;  %v4860_v6 = vld [vmem:[%s6011_s3 + $0x210] sm:$0xff]  }
 0xb47   :  { %4431 = vmatpush3.bf16.msra.mxu1 %v4831_v8  ;;  %v4862_v8 = vld [vmem:[%s6011_s3 + $0x258] sm:$0xff]  }
 0xb48   :  { %4432 = vmatprep.subr.bf16.mxu1 %v4833_v10  ;;  %v4864_v10 = vld [vmem:[%s6011_s3 + $0x218] sm:$0xff]  }
 0xb4b   :  { %4433 = vmatpush3.bf16.msra.mxu1 %v4835_v12  ;;  %v4866_v12 = vld [vmem:[%s6011_s3 + $0x260] sm:$0xff]  }
 0xb4c   :  { %4434 = vmatprep.subr.bf16.mxu1 %v4837_v16  ;;  %v4868_v16 = vld [vmem:[%s6011_s3 + $0x220] sm:$0xff]  }
 0xb4f   :  { %4435 = vmatpush3.bf16.msra.mxu1 %v4838_v17  ;;  %v4869_v17 = vld [vmem:[%s6011_s3 + $0x2d8] sm:$0xff]  }
 0xb50   :  { %4436 = vmatprep.subr.bf16.mxu1 %v4842_v19  ;;  %v4871_v19 = vld [vmem:[%s6011_s3 + $0x298] sm:$0xff]  }
 0xb53   :  { %4437 = vmatpush3.bf16.msra.mxu1 %v4843_v20  ;;  %v4872_v20 = vld [vmem:[%s6011_s3 + $0x228] sm:$0xff]  }
 0xb54   :  { %2546 = vmatprep.subr.bf16.mxu1 %v4849_v21  ;;  %v4873_v21 = vld [vmem:[%s6011_s3 + $0x2e0] sm:$0xff]  }
 0xc01   :  { %v2023_v26 = vpop.f32.mrb[24].mxu1 }
 0xc02   :  { %v2024_v27 = vadd.f32 %v2023_v26, %v1949_v23  ;;  %v2025_v28 = vpop.f32.mrb[25].mxu1  ;;  %v4875_v23 = vld [vmem:[%s6011_s3 + $0x2a0] sm:$0xff]   ;;  %v4877_v26 = vld [vmem:[%s6011_s3 + $0x2e8] sm:$0xff]  }
 0xc03   :  { %v2026_v29 = vadd.f32 %v2025_v28, %v1953_v25  ;;  %v2027_v30 = vpop.f32.mrb[26].mxu1  ;;  %v4876_v25 = vld [vmem:[%s6011_s3 + $0x230] sm:$0xff]   ;;  %v4879_v28 = vld [vmem:[%s6011_s3 + $0x2a8] sm:$0xff]  }
 0xc04   :  { %v2071_v31 = vmax.f32 %v2024_v27, 0.0  ;;  %v2028_v32 = vpop.f32.mrb[27].mxu1  ;;  %v4878_v27 = vld [vmem:[%s6011_s3 + $0x278] sm:$0xff]   ;;  %v4881_v30 = vld [vmem:[%s6011_s3 + $0x2f0] sm:$0xff]  }
 0xc05   :  { %v2072_v33 = vmax.f32 %v2026_v29, 0.0  ;;  %v4880_v29 = vld [vmem:[%s6011_s3 + $0x238] sm:$0xff]  }
 0xc06   :  { %v2075_v39 = vpack.c.bf16 %v2071_v31, %v2071_v31  ;;  %v4882_v31 = vld [vmem:[%s6011_s3 + $0x2b0] sm:$0xff]   ;;  %v4883_v32 = vld [vmem:[%s6011_s3 + $0x2f8] sm:$0xff]  }
 0xc07   :  { %v2076_v35 = vpack.c.bf16 %v2072_v33, %v2072_v33  ;;  %v4884_v33 = vld [vmem:[%s6011_s3 + $0x2b8] sm:$0xff]  }
 0xc09   :  { %v2064_v41 = vpop.f32.mrb[28].mxu1  ;;  %2376 = vmatprep.mubr.bf16.mxu0 %v2076_v35 }
 0xc0a   :  { %v2065_v42 = vadd.f32 %v2064_v41, %v1957_v34  ;;  %v2066_v45 = vpop.f32.mrb[29].mxu1  ;;  %2377 = vmatmul.mubr.bf16.vlgmr.msra.gmra.mrb[32].mxu0 %v2075_v39  ;;  %v4012_v39 = vld [vmem:[%s6010_s2 + $0x8] sm:$0xf] }
 0xc0b   :  { %v2067_v44 = vadd.f32 %v2066_v45, %v1961_v37  ;;  %v2068_v48 = vpop.f32.mrb[30].mxu1  ;;  %2506 = vmatpush1.bf16.msra.mxu0 %v4839_v38  ;;  %2537 = vmatprep.mubr.bf16.mxu0 %v4948_v2  ;;  %v2445_v41 = vrot.slane %v4012_v39, %v5154_v46  ;;  %v3970_v45 = vld [vmem:[%s6019_s11 + $0x1] ss:$0 sm:$0xff] }
 0xc0c   :  { %v2073_v53 = vmax.f32 %v2065_v42, 0.0  ;;  %v2069_v54 = vpop.f32.mrb[31].mxu1  ;;  %2507 = vmatprep.subr.bf16.mxu0 %v4846_v40  ;;  %v2449_v42 = vrot.slane %v4012_v39, %v5161_v49 }
 0xc0d   :  { %v2074_v56 = vmax.f32 %v2067_v44, 0.0 }
 0xc0e   :  { %v2077_v60 = vpack.c.bf16 %v2073_v53, %v2073_v53 }
 0xc0f   :  { %v2078_v58 = vpack.c.bf16 %v2074_v56, %v2074_v56  ;;  %2508 = vmatpush1.bf16.msra.mxu0 %v4844_v51 }
 0xc10   :  { %4444 = vmatprep.subr.bf16.mxu0 %v4853_v55 }
 0xc11   :  { %2416 = vmatprep.mubr.bf16.mxu1 %v2078_v58 }
 0xc12   :  { %2417 = vmatmul.mubr.bf16.vlgmr.msra.gmra.mrb[32].mxu1 %v2077_v60  ;;  %4021 = vmatmul.mubr.msk.bf16.vlgmr.msra.gmra.mrb[36].mxu0 %vm118_vm0, %v2429_v57 }
 0xc13   :  { %2547 = vmatpush1.bf16.msra.mxu1 %v4847_v59  ;;  %2578 = vmatprep.mubr.bf16.mxu1 %v4948_v2 }
 0xc14   :  { %2548 = vmatprep.subr.bf16.mxu1 %v4852_v61  ;;  %4445 = vmatpush3.bf16.msra.mxu0 %v4854_v62 }
 0xc15   :  { %4446 = vmatprep.subr.bf16.mxu0 %v4855_v63  ;;  %v4923_v63 = vld [vmem:[%s6008_s0] sm:$0xff] }
 0xc17   :  { %2549 = vmatpush1.bf16.msra.mxu1 %v4850_v0  ;;  %v1230_v0 = vsub.f32 %v5483_v24, %v4923_v63 }
 0xc18   :  { %4447 = vmatpush3.bf16.msra.mxu0 %v4856_v1  ;;  %4466 = vmatprep.subr.bf16.mxu1 %v4857_v3 }
 0xc19   :  { %4448 = vmatprep.subr.bf16.mxu0 %v4858_v4 }
 0xc1a   :  { %4022 = vmatmul.mubr.msk.bf16.vlgmr.msra.gmra.mrb[36].mxu1 %vm118_vm0, %v2429_v57 }
 0xc1b   :  { %4467 = vmatpush3.bf16.msra.mxu1 %v4859_v5  ;;  %v2453_v5 = vrot.slane %v4012_v39, %v5156_v47 }
 0xc1c   :  { %4449 = vmatpush3.bf16.msra.mxu0 %v4860_v6  ;;  %4468 = vmatprep.subr.bf16.mxu1 %v4861_v7 }
 0xc1d   :  { %4450 = vmatprep.subr.bf16.mxu0 %v4862_v8  ;;  %v2457_v8 = vrot.slane %v4012_v39, %v5163_v50 }
 0xc1f   :  { %4469 = vmatpush3.bf16.msra.mxu1 %v4863_v9  ;;  %v1231_v9 = vmul.f32 %v1230_v0, %v1230_v0  ;;  %v4130_v0 = vld [vmem:[%s6013_s5 + $0xa0] sm:$0xff] }
 0xc20   :  { %4451 = vmatpush3.bf16.msra.mxu0 %v4864_v10  ;;  %4470 = vmatprep.subr.bf16.mxu1 %v4865_v11 }
 0xc21   :  { %4452 = vmatprep.subr.bf16.mxu0 %v4866_v12 }
 0xc23   :  { %4471 = vmatpush3.bf16.msra.mxu1 %v4867_v13 }
 0xc24   :  { %4453 = vmatpush3.bf16.msra.mxu0 %v4868_v16  ;;  %4472 = vmatprep.subr.bf16.mxu1 %v4869_v17 }
 0xc25   :  { %4454 = vmatprep.subr.bf16.mxu0 %v4870_v18 }
 0xc27   :  { %4473 = vmatpush3.bf16.msra.mxu1 %v4871_v19 }
 0xc28   :  { %4455 = vmatpush3.bf16.msra.mxu0 %v4872_v20  ;;  %4474 = vmatprep.subr.bf16.mxu1 %v4873_v21 }
 0xc29   :  { %4456 = vmatprep.subr.bf16.mxu0 %v4874_v22  ;;  %v4121_v22 = vld [vmem:[%s6014_s6 + $0x20] sm:$0xff] }
 0xc2b   :  { %4475 = vmatpush3.bf16.msra.mxu1 %v4875_v23  ;;  %v4122_v23 = vld [vmem:[%s6014_s6 + $0x28] sm:$0xff] }
 0xc2c   :  { %4457 = vmatpush3.bf16.msra.mxu0 %v4876_v25  ;;  %4476 = vmatprep.subr.bf16.mxu1 %v4877_v26  ;;  %v4653_v25 = vpack.c.bf16 %v4122_v23, %v4121_v22 }
 0xc2d   :  { %4458 = vmatprep.subr.bf16.mxu0 %v4878_v27 }
 0xc2f   :  { %4477 = vmatpush3.bf16.msra.mxu1 %v4879_v28 }
 0xc30   :  { %4459 = vmatpush3.bf16.msra.mxu0 %v4880_v29  ;;  %4478 = vmatprep.subr.bf16.mxu1 %v4881_v30 }
 0xc31   :  { %4652 = vmatprep.subr.bf16.mxu0 %v4949_v43 }
 0xc33   :  { %4479 = vmatpush3.bf16.msra.mxu1 %v4882_v31  ;;  %v4088_v31 = vld [vmem:[%s6012_s4 + $0x2] ss:$0 sm:$0xff] }
 0xc34   :  { %4480 = vmatprep.subr.bf16.mxu1 %v4883_v32 }
 0xc37   :  { %4481 = vmatpush3.bf16.msra.mxu1 %v4884_v33 }
 0xc38   :  { %4655 = vmatprep.subr.bf16.mxu1 %v4949_v43 }
 0xcdd   :  { %v4416_v34 = vpop.f32.mrb[32].mxu0 }
 0xcde   :  { %v4417_v35 = vpop.f32.mrb[33].mxu0 }
 0xcdf   :  { %v4418_v37 = vadd.f32 %v4417_v35, %v4416_v34  ;;  %v4419_v38 = vpop.f32.mrb[34].mxu0 }
 0xce0   :  { %v4420_v40 = vpop.f32.mrb[35].mxu0 }
 0xce1   :  { %v2379_v55 = vadd.f32 %v4418_v37, %v3970_v45  ;;  %v4124_v40 = vld [vmem:[%s6015_s7 + $0x2] sm:$0x1] }
 0xce5   :  { %v4438_v44 = vpop.f32.mrb[32].mxu1  ;;  %v2539_v48 = vpop.f32.mrb[36].mxu0 }
 0xce6   :  { %v4439_v51 = vpop.f32.mrb[33].mxu1  ;;  %v2540_v53 = vadd.f32 %v2539_v48, %v2445_v41  ;;  %v2541_v54 = vpop.f32.mrb[37].mxu0  ;;  %v3018_v41 = vmul.f32 0.5, %v4124_v40  ;;  %v4903_v40 = vld [vmem:[%s6018_s10 + $0x260] sm:$0xff]  }
 0xce7   :  { %v4440_v56 = vadd.f32 %v4439_v51, %v4438_v44  ;;  %v4441_v57 = vpop.f32.mrb[34].mxu1  ;;  %v2542_v58 = vadd.f32 %v2541_v54, %v2449_v42  ;;  %v2543_v59 = vpop.f32.mrb[38].mxu0 }
 0xce8   :  { %v2587_v60 = vmax.f32 %v2540_v53, 0.0  ;;  %v4442_v61 = vpop.f32.mrb[35].mxu1  ;;  %v2544_v62 = vpop.f32.mrb[39].mxu0  ;;  %v3023_v42 = vrot.slane %v3018_v41, %v5154_v46  ;;  %v4127_v59 = vld [vmem:[%s6013_s5 + $0x88] sm:$0xff]  ;;  %v4905_v41 = vld [vmem:[%s6018_s10 + $0x220] sm:$0xff]  }
 0xce9   :  { %v2419_v1 = vadd.f32 %v4440_v56, %v2379_v55  ;;  %v2588_v3 = vmax.f32 %v2542_v58, 0.0  ;;  %v4126_v58 = vld [vmem:[%s6013_s5 + $0x80] sm:$0xff]  ;;  %v4129_v62 = vld [vmem:[%s6013_s5 + $0x98] sm:$0xff] }
 0xcea   :  { %v2591_v4 = vpack.c.bf16 %v2587_v60, %v2587_v60  ;;  %v4128_v60 = vld [vmem:[%s6013_s5 + $0x90] sm:$0xff]  ;;  %v4656_v61 = vpack.c.bf16 %v4127_v59, %v4126_v58  ;;  %v4917_v58 = vld [vmem:[%s6018_s10 + $0x238] sm:$0xff]   ;;  %v4918_v59 = vld [vmem:[%s6018_s10 + $0x2a8] sm:$0xff]  }
 0xceb   :  { %v2424_v6 = vsub.f32 %v2419_v1, %v5361_v14  ;;  %v2592_v7 = vpack.c.bf16 %v2588_v3, %v2588_v3  ;;  %v4659_v63 = vpack.c.bf16 %v4129_v62, %v4128_v60  ;;  %v4131_v1 = vld [vmem:[%s6013_s5 + $0xa8] sm:$0xff]  ;;  %v4919_v60 = vld [vmem:[%s6018_s10 + $0x2f0] sm:$0xff]   ;;  %v4921_v62 = vld [vmem:[%s6018_s10 + $0x2f8] sm:$0xff]  }
 0xcec   :  { %v4662_v3 = vpack.c.bf16 %v4131_v1, %v4130_v0 }
 0xced   :  { %v2425_v10 = vmul.f32 %v2424_v6, %v2424_v6  ;;  %v2580_v11 = vpop.f32.mrb[36].mxu1  ;;  %2892 = vmatprep.mubr.bf16.mxu0 %v2592_v7 }
 0xcee   :  { %v2581_v12 = vadd.f32 %v2580_v11, %v2453_v5  ;;  %v2582_v13 = vpop.f32.mrb[37].mxu1  ;;  %2893 = vmatmul.mubr.bf16.vlgmr.msra.gmra.mrb[40].mxu0 %v2591_v4  ;;  %v4887_v11 = vld [vmem:[%s6016_s8 + $0x44] ss:$16 sps:$4 sm:$0xff]  }
 0xcef   :  { %v2583_v16 = vadd.f32 %v2582_v13, %v2457_v8  ;;  %v2584_v17 = vpop.f32.mrb[38].mxu1  ;;  %4600 = vmatprep.mubr.msk.f32.mxu0 %vm4950_vm1, %v4951_v15  ;;  %v5807_v24 = vadd.f32 %v2425_v10, %v1231_v9  ;;  %4654 = vmatpush3.bf16.msra.mxu0 %v4653_v25  ;;  %v4132_v8 = vld [vmem:[%s6013_s5 + $0xb0] sm:$0xff]  ;;  %v4133_v9 = vld [vmem:[%s6013_s5 + $0xb8] sm:$0xff] }
 0xcf0   :  { %v2589_v18 = vmax.f32 %v2581_v12, 0.0  ;;  %v2585_v19 = vpop.f32.mrb[39].mxu1  ;;  %v4665_v10 = vpack.c.bf16 %v4133_v9, %v4132_v8  ;;  %3198 = vmatprep.subr.bf16.mxu0 %v4887_v11  ;;  %v4139_v8 = vld [vmem:[%s6017_s9 + $0x8] sm:$0xf] }
 0xcf1   :  { %v2590_v14 = vmax.f32 %v2583_v16, 0.0  ;;  %v3158_v9 = vrot.slane %v4139_v8, %v5154_v46 }
 0xcf2   :  { %v2593_v21 = vpack.c.bf16 %v2589_v18, %v2589_v18 }
 0xcf3   :  { %v2594_v20 = vpack.c.bf16 %v2590_v14, %v2590_v14  ;;  %v4890_v14 = vld [vmem:[%s6016_s8 + $0x4c] ss:$16 sps:$4 sm:$0xff]  }
 0xcf5   :  { %2932 = vmatprep.mubr.bf16.mxu1 %v2594_v20 }
 0xcf6   :  { %2933 = vmatmul.mubr.bf16.vlgmr.msra.gmra.mrb[40].mxu1 %v2593_v21  ;;  %v4888_v21 = vld [vmem:[%s6016_s8 + $0x48] ss:$16 sps:$4 sm:$0xff]  }
 0xcf7   :  { %4619 = vmatprep.mubr.msk.f32.mxu1 %vm4950_vm1, %v4951_v15  ;;  %4657 = vmatpush3.bf16.msra.mxu1 %v4656_v61  ;;  %v4920_v61 = vld [vmem:[%s6018_s10 + $0x2b0] sm:$0xff]  }
 0xcf8   :  { %4658 = vmatprep.subr.bf16.mxu1 %v4949_v43 }
 0xcfb   :  { %4660 = vmatpush3.bf16.msra.mxu1 %v4659_v63  ;;  %v4922_v63 = vld [vmem:[%s6018_s10 + $0x2b8] sm:$0xff]  }
 0xcfc   :  { %4661 = vmatprep.subr.bf16.mxu1 %v4949_v43 }
 0xcff   :  { %4663 = vmatpush3.bf16.msra.mxu1 %v4662_v3 }
 0xd00   :  { %4664 = vmatprep.subr.bf16.mxu1 %v4949_v43  ;;  %v4885_v43 = vld [vmem:[%s6016_s8 + $0x40] ss:$16 sps:$4 sm:$0xff]  }
 0xd03   :  { %4666 = vmatpush3.bf16.msra.mxu1 %v4665_v10  ;;  %v3162_v10 = vrot.slane %v4139_v8, %v5161_v49 }
 0xdc1   :  { %v4460_v26 = vpop.f32.mrb[40].mxu0 }
 0xdc2   :  { %v4461_v27 = vpop.f32.mrb[41].mxu0 }
 0xdc3   :  { %v4462_v28 = vadd.f32 %v4461_v27, %v4460_v26  ;;  %v4463_v29 = vpop.f32.mrb[42].mxu0  ;;  %v4892_v27 = vld [vmem:[%s6018_s10 + $0x200] sm:$0xff]  }
 0xdc4   :  { %v4464_v30 = vpop.f32.mrb[43].mxu0  ;;  %v4898_v29 = vld [vmem:[%s6018_s10 + $0x280] sm:$0xff]  }
 0xdc5   :  { %v2895_v34 = vadd.f32 %v4462_v28, %v4088_v31  ;;  %v4893_v28 = vld [vmem:[%s6018_s10 + $0x248] sm:$0xff]  }
 0xdc6   :  { %v4894_v30 = vld [vmem:[%s6018_s10 + $0x208] sm:$0xff]  }
 0xdc7   :  { %v4900_v31 = vld [vmem:[%s6018_s10 + $0x2c8] sm:$0xff]  }
 0xdc9   :  { %v4482_v32 = vpop.f32.mrb[40].mxu1 }
 0xdca   :  { %v4483_v33 = vpop.f32.mrb[41].mxu1 }
 0xdcb   :  { %v4484_v35 = vadd.f32 %v4483_v33, %v4482_v32  ;;  %v4485_v37 = vpop.f32.mrb[42].mxu1  ;;  %v4895_v32 = vld [vmem:[%s6018_s10 + $0x250] sm:$0xff]   ;;  %v4902_v33 = vld [vmem:[%s6018_s10 + $0x288] sm:$0xff]  }
 0xdcc   :  { %v4486_v38 = vpop.f32.mrb[43].mxu1  ;;  %v4899_v37 = vld [vmem:[%s6018_s10 + $0x258] sm:$0xff]  }
 0xdcd   :  { %v2935_v39 = vadd.f32 %v4484_v35, %v2895_v34  ;;  %v4904_v34 = vld [vmem:[%s6018_s10 + $0x2d0] sm:$0xff]  }
 0xdce   :  { %v4897_v35 = vld [vmem:[%s6018_s10 + $0x210] sm:$0xff]  }
 0xdcf   :  { %4601 = vmatmul.mubr.msk.f32.vlgmr.msra.gmra.mrb[44].mxu0 %vm557_vm2, %v2935_v39  ;;  %v4906_v38 = vld [vmem:[%s6018_s10 + $0x290] sm:$0xff]  }
 0xdd0   :  { %3230 = vmatprep.mubr.bf16.mxu0 %v4948_v2  ;;  %3199 = vmatpush1.bf16.msra.mxu0 %v4885_v43 }
 0xdd1   :  { %3239 = vmatprep.subr.bf16.mxu0 %v4890_v14  ;;  %v3166_v14 = vrot.slane %v4139_v8, %v5156_v47 }
 0xea2   :  { %v3012_v45 = vpop.f32.mrb[44].mxu0 }
 0xea3   :  { %v3025_v44 = vsub.f32 %v3012_v45, %v3023_v42  ;;  %v4602_v48 = vpop.f32.mrb[45].mxu0  ;;  %v4907_v42 = vld [vmem:[%s6018_s10 + $0x268] sm:$0xff]   ;;  %v4908_v45 = vld [vmem:[%s6018_s10 + $0x2d8] sm:$0xff]  }
 0xea4   :  { %v4910_v48 = vld [vmem:[%s6018_s10 + $0x298] sm:$0xff]  }
 0xea5   :  { %v3026_v51 = vsel %vm640_vm3, %v3025_v44, -inf }
 0xea6   :  { %3027 = vmax.xlane.f32.xlu0 %v3026_v51  ;;  %v4911_v51 = vld [vmem:[%s6018_s10 + $0x270] sm:$0xff]  }
 0xf33   :  { %v3028_v53 = vpop.xlane.xlu0 %3027 }
 0xf34   :  { %vm3029_vm10 = vcmp.ge.f32.partialorder %v3025_v44, %v3028_v53  ;;  %v4909_v44 = vld [vmem:[%s6018_s10 + $0x228] sm:$0xff]   ;;  %v4912_v53 = vld [vmem:[%s6018_s10 + $0x2e0] sm:$0xff]  }
 0xf35   :  { %v3030_v54 = vsel %vm3029_vm10, %v5190_v36, 64 }
 0xf36   :  { %v3031_v55 = vsel %vm640_vm3, %v3030_v54, 2147483647  ;;  %v4913_v54 = vld [vmem:[%s6018_s10 + $0x230] sm:$0xff]  }
 0xf37   :  { %v3033_v56 = vshra.s32 %v3031_v55, 16  ;;  %v3032_v4 = vand.u32 65535, %v3031_v55  ;;  %v4914_v55 = vld [vmem:[%s6018_s10 + $0x2a0] sm:$0xff]  }
 0xf39   :  { %v3035_v57 = vcvt.s32.f32 %v3033_v56  ;;  %v3034_v6 = vcvt.s32.f32 %v3032_v4  ;;  %v4915_v56 = vld [vmem:[%s6018_s10 + $0x278] sm:$0xff]  }
 0xf3b   :  { %3036 = vmin.xlane.f32.xlu1 %v3035_v57 }
 0xfc8   :  { %v3037_v5 = vpop.xlane.xlu1 %3036 }
 0xfc9   :  { %vm3038_vm11 = vcmp.eq.f32.partialorder %v3035_v57, %v3037_v5  ;;  %v3043_v12 = vcvt.f32.s32 %v3037_v5  ;;  %v4916_v57 = vld [vmem:[%s6018_s10 + $0x2e8] sm:$0xff]  }
 0xfca   :  { %v3039_v7 = vsel %vm3038_vm11, %v3034_v6, inf }
 0xfcb   :  { %3040 = vmin.xlane.f32.xlu0 %v3039_v7  ;;  %v3044_v16 = vshll.u32 %v3043_v12, 16 }
0x1058   :  { %v3041_v13 = vpop.xlane.xlu0 %3040 }
0x1059   :  { %v3042_v17 = vcvt.f32.s32 %v3041_v13 }
0x105b   :  { %v3045_v18 = vadd.s32 %v3044_v16, %v3042_v17 }
0x105d   :  { %vm3046_vm12 = vcmp.eq.s32.totalorder %v5190_v36, %v3045_v18  ;;  %v4891_v36 = vld [vmem:[%s6018_s10 + $0x240] sm:$0xff]  }
0x105e   :  { %v4125_v19 = vsel %vm3046_vm12, 1.0, %v4951_v15  ;;  %4500 = vmatprep.subr.bf16.mxu1 %v4891_v36 }
0x105f   :  { %4620 = vmatmul.mubr.msk.f32.vlgmr.msra.gmra.mrb[44].mxu1 %vm640_vm3, %v4125_v19 }
0x1060   :  { %4501 = vmatpush3.bf16.msra.mxu1 %v4892_v27 }
0x1061   :  { %4502 = vmatprep.subr.bf16.mxu1 %v4893_v28 }
0x1064   :  { %4503 = vmatpush3.bf16.msra.mxu1 %v4894_v30 }
0x1065   :  { %4504 = vmatprep.subr.bf16.mxu1 %v4895_v32  ;;  %v4211_v32 = vld [vmem:[%s6019_s11 + $0x2] ss:$0 sm:$0xff] }
0x1068   :  { %4505 = vmatpush3.bf16.msra.mxu1 %v4897_v35 }
0x1069   :  { %4506 = vmatprep.subr.bf16.mxu1 %v4899_v37 }
0x1132   :  { %v3127_v20 = vpop.f32.mrb[44].mxu1 }
0x1133   :  { %v3131_v22 = vsub.f32 %v3127_v20, %v2935_v39  ;;  %v3146_v23 = vpack.c.bf16 %v3127_v20, %v3127_v20  ;;  %v4621_v25 = vpop.f32.mrb[45].mxu1  ;;  %v4901_v39 = vld [vmem:[%s6018_s10 + $0x218] sm:$0xff]  }
0x1134   :  { %4507 = vmatpush3.bf16.msra.mxu1 %v4901_v39 }
0x1135   :  { %v3132_v26 = vmul.f32 %v3131_v22, %v3131_v22  ;;  %4144 = vmatmul.mubr.msk.bf16.vlgmr.msra.gmra.mrb[48].mxu0 %vm557_vm2, %v3146_v23  ;;  %4508 = vmatprep.subr.bf16.mxu1 %v4903_v40 }
0x1136   :  { %3240 = vmatpush1.bf16.msra.mxu0 %v4888_v21  ;;  %3271 = vmatprep.mubr.bf16.mxu0 %v4948_v2  ;;  %v4896_v2 = vld [vmem:[%s6018_s10 + $0x2c0] sm:$0xff]   ;;  %v3170_v21 = vrot.slane %v4139_v8, %v5163_v50 }
0x1137   :  { %v3133_v15 = vsel %vm557_vm2, %v3132_v26, 0.0  ;;  %4522 = vmatprep.subr.bf16.mxu0 %v4896_v2 }
0x1138   :  { %3134 = vadd.xlane.f32.xlu1 %v3133_v15  ;;  %4509 = vmatpush3.bf16.msra.mxu1 %v4905_v41 }
0x1139   :  { %4510 = vmatprep.subr.bf16.mxu1 %v4907_v42 }
0x113c   :  { %4511 = vmatpush3.bf16.msra.mxu1 %v4909_v44 }
0x113d   :  { %4145 = vmatmul.mubr.msk.bf16.vlgmr.msra.gmra.mrb[52].mxu0 %vm557_vm2, %v3146_v23  ;;  %4512 = vmatprep.subr.bf16.mxu1 %v4911_v51 }
0x113e   :  { %4523 = vmatpush3.bf16.msra.mxu0 %v4898_v29 }
0x113f   :  { %4524 = vmatprep.subr.bf16.mxu0 %v4900_v31 }
0x1140   :  { %4513 = vmatpush3.bf16.msra.mxu1 %v4913_v54 }
0x1141   :  { %4514 = vmatprep.subr.bf16.mxu1 %v4915_v56 }
0x1142   :  { %4525 = vmatpush3.bf16.msra.mxu0 %v4902_v33 }
0x1143   :  { %4526 = vmatprep.subr.bf16.mxu0 %v4904_v34 }
0x1144   :  { %4515 = vmatpush3.bf16.msra.mxu1 %v4917_v58 }
0x1146   :  { %4527 = vmatpush3.bf16.msra.mxu0 %v4906_v38 }
0x1147   :  { %4528 = vmatprep.subr.bf16.mxu0 %v4908_v45 }
0x114a   :  { %4529 = vmatpush3.bf16.msra.mxu0 %v4910_v48 }
0x114b   :  { %4530 = vmatprep.subr.bf16.mxu0 %v4912_v53 }
0x114e   :  { %4531 = vmatpush3.bf16.msra.mxu0 %v4914_v55 }
0x114f   :  { %4532 = vmatprep.subr.bf16.mxu0 %v4916_v57 }
0x1152   :  { %4533 = vmatpush3.bf16.msra.mxu0 %v4918_v59 }
0x1153   :  { %4534 = vmatprep.subr.bf16.mxu0 %v4919_v60 }
0x1156   :  { %4535 = vmatpush3.bf16.msra.mxu0 %v4920_v61 }
0x1157   :  { %4536 = vmatprep.subr.bf16.mxu0 %v4921_v62 }
0x115a   :  { %4537 = vmatpush3.bf16.msra.mxu0 %v4922_v63 }
0x11c5   :  { %v3135_v0 = vpop.xlane.xlu1 %3134 }
0x11c6   :  { %v3136_v1 = vrot.slane %v3135_v0, 4 }
0x11c8   :  { %v3137_v3 = vadd.f32 %v3136_v1, %v3135_v0 }
0x11ca   :  { %v3138_v4 = vrot.slane %v3137_v3, 2 }
0x11cc   :  { %v3139_v5 = vadd.f32 %v3138_v4, %v3137_v3 }
0x11ce   :  { %v3140_v6 = vrot.slane %v3139_v5, 1 }
0x11d0   :  { %v3141_v7 = vadd.f32 %v3140_v6, %v3139_v5 }
0x11d2   :  { %4667 = vpush %v3141_v7 }
0x1203   :  { %s4668_s30 = spop %4667 }
0x1204   :  { %s3145_s1 = smul.f32 0.0078125, %s4668_s30 }
0x1206   :  { %s3649_s2 = smul.f32 0.33333334, %s3145_s1 }
0x1208   :  { %3651 = sst [smem:[#allocation4]] %s3649_s2  ;;  %v3232_v43 = vpop.f32.mrb[48].mxu0 }
0x1209   :  { %v3233_v11 = vadd.f32 %v3232_v43, %v3158_v9  ;;  %v3234_v12 = vpop.f32.mrb[49].mxu0 }
0x120a   :  { %v3235_v13 = vadd.f32 %v3234_v12, %v3162_v10  ;;  %v3236_v16 = vpop.f32.mrb[50].mxu0 }
0x120b   :  { %v3280_v17 = vmax.f32 %v3233_v11, 0.0  ;;  %v3237_v18 = vpop.f32.mrb[51].mxu0 }
0x120c   :  { %v3281_v19 = vmax.f32 %v3235_v13, 0.0 }
0x120d   :  { %v3284_v22 = vpack.c.bf16 %v3280_v17, %v3280_v17 }
0x120e   :  { %v3285_v20 = vpack.c.bf16 %v3281_v19, %v3281_v19 }
0x1210   :  { %v3273_v23 = vpop.f32.mrb[52].mxu0  ;;  %3585 = vmatprep.mubr.bf16.mxu1 %v3285_v20 }
0x1211   :  { %v3274_v46 = vadd.f32 %v3273_v23, %v3166_v14  ;;  %v3275_v25 = vpop.f32.mrb[53].mxu0  ;;  %3586 = vmatmul.mubr.bf16.vlgmr.msra.gmra.mrb[48].mxu1 %v3284_v22 }
0x1212   :  { %v3276_v49 = vadd.f32 %v3275_v25, %v3170_v21  ;;  %v3277_v26 = vpop.f32.mrb[54].mxu0 }
0x1213   :  { %v3282_v15 = vmax.f32 %v3274_v46, 0.0  ;;  %v3278_v36 = vpop.f32.mrb[55].mxu0 }
0x1214   :  { %v3283_v27 = vmax.f32 %v3276_v49, 0.0 }
0x1215   :  { %v3286_v2 = vpack.c.bf16 %v3282_v15, %v3282_v15 }
0x1216   :  { %v3287_v28 = vpack.c.bf16 %v3283_v27, %v3283_v27 }
0x1218   :  { %3625 = vmatprep.mubr.bf16.mxu0 %v3287_v28 }
0x1219   :  { %3626 = vmatmul.mubr.bf16.vlgmr.msra.gmra.mrb[56].mxu0 %v3286_v2 }
0x12e4   :  { %v4516_v29 = vpop.f32.mrb[48].mxu1 }
0x12e5   :  { %v4517_v47 = vpop.f32.mrb[49].mxu1 }
0x12e6   :  { %v4518_v30 = vadd.f32 %v4517_v47, %v4516_v29  ;;  %v4519_v31 = vpop.f32.mrb[50].mxu1 }
0x12e7   :  { %v4520_v50 = vpop.f32.mrb[51].mxu1 }
0x12e8   :  { %v3588_v35 = vadd.f32 %v4518_v30, %v4211_v32 }
0x12ec   :  { %v4538_v33 = vpop.f32.mrb[56].mxu0 }
0x12ed   :  { %v4539_v34 = vpop.f32.mrb[57].mxu0 }
0x12ee   :  { %v4540_v37 = vadd.f32 %v4539_v34, %v4538_v33  ;;  %v4541_v38 = vpop.f32.mrb[58].mxu0 }
0x12ef   :  { %v4542_v39 = vpop.f32.mrb[59].mxu0 }
0x12f0   :  { %v3628_v40 = vadd.f32 %v4540_v37, %v3588_v35 }
0x12f2   :  { %v3633_v41 = vsub.f32 %v3628_v40, %v5676_v52 }
0x12f4   :  { %v3634_v42 = vmul.f32 %v3633_v41, %v3633_v41 }
0x12f6   :  { %v3635_v45 = vadd.f32 %v3634_v42, %v5807_v24 }
0x12f8   :  { %v3636_v44 = vsel %vm118_vm0, %v3635_v45, 0.0 }
0x12f9   :  { %3637 = vadd.xlane.f32.xlu0 %v3636_v44 }
0x12fa   :  { %4933 = shalt.err (!%p4930_p2)
}
0x12fb   :  { %s4952_s17 = smov [#allocation4]   ;;  %s4934_s20 = scalar_lea.hbm %s6020_s12, 16 }
0x12fc   :  { %3667 = dma.smem_to_hbm %s4952_s17, 16, %s6021_s13, [#allocation5]  }
0x12fd   :  { %p4935_p3 = scmp.ne.s32.totalorder %s6020_s12, %s4934_s20  ;;  %p4938_p4 = scmp.lt.u32.totalorder %s4934_s20, %s6020_s12 }
0x12ff   :  { %p4940_p5 = pnand %p4938_p4, %p4935_p3 }
0x1386   :  { %v3638_v52 = vpop.xlane.xlu0 %3637 }
0x1387   :  { %v3639_v24 = vrot.slane %v3638_v52, 4 }
0x1389   :  { %v3640_v48 = vadd.f32 %v3639_v24, %v3638_v52 }
0x138b   :  { %v3641_v51 = vrot.slane %v3640_v48, 2 }
0x138d   :  { %v3642_v53 = vadd.f32 %v3641_v51, %v3640_v48 }
0x138f   :  { %v3643_v54 = vrot.slane %v3642_v53, 1 }
0x1391   :  { %v3644_v55 = vadd.f32 %v3643_v54, %v3642_v53 }
0x1393   :  { %4669 = vpush %v3644_v55 }
0x13c4   :  { %s4670_s19 = spop %4669 }
0x13c5   :  { %s3646_s4 = smul.f32 0.0013020834, %s4670_s19 }
0x13c7   :  { %3648 = sst [smem:[#allocation2]] %s3646_s4 }
0x13c8   :  { %4943 = shalt.err (!%p4940_p5)
}
0x13c9   :  { %s4953_s24 = smov [#allocation2]  }
0x13ca   :  { %3659 = dma.smem_to_hbm %s4953_s24, 16, %s6020_s12, [#allocation3]  }
0x13cb   :  { %4944 = dma.done.wait [#allocation3], 16  }
0x13cc   :  { %4945 = vsyncadd [#allocation3], 4294967280 }
0x13cd   :  { %4946 = dma.done.wait [#allocation5], 16  }
0x13ce   :  { %4947 = vsyncadd [#allocation5], 4294967280 }
0x13cf   :  { %3674 = sfence }
0x13d0   :  { %3675 = vsyncpa [#allocation3], 1 }
0x13d1   :  { %3676 = vsyncpa [#allocation5], 1 }

</bundles_post_ra>
